<compile_context>
chip_gen: v7x
topology: tpu7x:2x2x1
jax: 0.10.0
libtpu: 0.0.40
codegen_flags: <defaults>
</compile_context>

<pallas_src>
import functools

import jax
import jax.numpy as jnp
from jax.experimental import pallas as pl


# ---------------------------------------------------------------------------
# Fused Pallas kernel: MHA + (residual + LN) + FFN + LN, (S, B, E) layout
# ---------------------------------------------------------------------------

def _fused_attention_block_kernel(
    x_ref,                      # (S, B, E)
    wqkv_ref, bqkv_ref,         # (E, 3E), (1, 3E)   packed [q; k; v], scale folded into q
    wo_ref, bo_ref,             # (H, d, E), (1, E)  out-proj, pre-split per head
    g_ref, beta_ref,            # (1, E), (1, E)     LayerNorm affine
    w1_ref, b1_ref,             # (E, F), (1, F)
    w2_ref, b2_ref,             # (F, E), (1, E)
    o_ref,                      # (S, B, E)
    *, n_heads, eps):
    S, B, E = x_ref.shape
    d = E // n_heads
    M = S * B

    x = x_ref[...].reshape(M, E)               # (M, E) slab; row r = (s, b), b minor

    def matmul(a, w):
        # a: (M, K), w: (K, N) MXU-native orientation (pre-transposed on host).
        return jax.lax.dot_general(
            a, w, (((1,), (0,)), ((), ())),
            preferred_element_type=jnp.float32)

    def layernorm(y):
        mu = jnp.mean(y, axis=-1, keepdims=True)
        var = jnp.mean(jnp.square(y - mu), axis=-1, keepdims=True)
        return (y - mu) * jax.lax.rsqrt(var + eps) * g_ref[...] + beta_ref[...]

    # --- MultiheadAttention --------------------------------------------------
    qkv = matmul(x, wqkv_ref[...]) + bqkv_ref[...]            # (M, 3E)
    q = qkv[:, :E]                                            # scale already folded in
    k = qkv[:, E:2 * E]
    v = qkv[:, 2 * E:]

    # Rows interleave (seq, batch) with batch minor; attention is only valid
    # within a batch, so mask score entries where row-batch != col-batch.
    # Built once, hoisted out of the head loop.
    row_b = jax.lax.broadcasted_iota(jnp.int32, (M, M), 0) % B
    col_b = jax.lax.broadcasted_iota(jnp.int32, (M, M), 1) % B
    same_batch = row_b == col_b
    neg = jnp.float32(-1e30)                                  # exp() underflows to exact 0

    attn_out = jnp.zeros((M, E), jnp.float32)
    for h in range(n_heads):                  # small, static, fully unrolled
        lo, hi = h * d, (h + 1) * d
        qh, kh, vh = q[:, lo:hi], k[:, lo:hi], v[:, lo:hi]    # (M, d) lane slices
        # Scores over all row pairs (batch folded into M), then same-batch mask.
        s = jax.lax.dot_general(qh, kh, (((1,), (1,)), ((), ())),
                                preferred_element_type=jnp.float32)   # (M, M)
        s = jnp.where(same_batch, s, neg)
        m = jnp.max(s, axis=-1, keepdims=True)
        p = jnp.exp(s - m)
        l = jnp.sum(p, axis=-1, keepdims=True)
        p = p * pl.reciprocal(l, approx=True)                 # EUP, not VPU divide
        ctx = matmul(p, vh)                                   # (M, d)
        # Per-head slice of the output projection; accumulating is identical to
        # concat(head_outs) @ Wo^T but needs no last-axis concatenate/relayout.
        attn_out = attn_out + matmul(ctx, wo_ref[h])          # (M, E)
    attn_out = attn_out + bo_ref[...]

    # --- residual + LayerNorm (dropout = identity) ---------------------------
    x1 = layernorm(attn_out + x)

    # --- PositionwiseFeedForward ---------------------------------------------
    h1 = jnp.maximum(matmul(x1, w1_ref[...]) + b1_ref[...], 0.0)
    z = matmul(h1, w2_ref[...]) + b2_ref[...]

    # --- final LayerNorm (no residual, per the PyTorch forward) --------------
    o_ref[...] = layernorm(z).reshape(S, B, E)


def prepare_params(params, n_heads):
    """One-time, host-side, OUTSIDE the jitted hot path.

    PyTorch (N, K) nn.Linear weights -> MXU-native (K, N); out-proj pre-split
    per head; 1/sqrt(d) softmax scale folded into the q third of the packed
    in-projection; biases / LN affine reshaped to (1, N) rows.
    """
    E = params["out_proj_w"].shape[0]
    assert E % n_heads == 0
    d = E // n_heads
    scale = 1.0 / float(d) ** 0.5
    col_scale = jnp.concatenate(
        [jnp.full((E,), scale, jnp.float32), jnp.ones((2 * E,), jnp.float32)])
    return {
        "wqkv_t": params["in_proj_w"].T * col_scale[None, :],        # (E, 3E)
        "bqkv": (params["in_proj_b"] * col_scale).reshape(1, -1),    # (1, 3E)
        "wo_heads": params["out_proj_w"].T.reshape(n_heads, d, E),   # (H, d, E)
        "bo": params["out_proj_b"].reshape(1, -1),
        "ln_g": params["ln_g"].reshape(1, -1),
        "ln_b": params["ln_b"].reshape(1, -1),
        "w1_t": params["w1"].T,                                      # (E, F)
        "b1": params["b1"].reshape(1, -1),
        "w2_t": params["w2"].T,                                      # (F, E)
        "b2": params["b2"].reshape(1, -1),
    }


def attention_block_forward(x, prepped, n_heads):
    """x: (S, B, E) -> (S, B, E). Single fused pallas_call, VMEM-resident,
    no wrapper-side activation transposes."""
    S, B, E = x.shape
    return pl.pallas_call(
        functools.partial(_fused_attention_block_kernel,
                          n_heads=n_heads, eps=1e-5),
        out_shape=jax.ShapeDtypeStruct((S, B, E), jnp.float32),
    )(x,
      prepped["wqkv_t"], prepped["bqkv"],
      prepped["wo_heads"], prepped["bo"],
      prepped["ln_g"], prepped["ln_b"],
      prepped["w1_t"], prepped["b1"],
      prepped["w2_t"], prepped["b2"])


# ---------------------------------------------------------------------------
# Pure-JAX reference (PyTorch-layout params, same math, no Pallas)
# ---------------------------------------------------------------------------

def reference_forward(x, params, n_heads):
    S, B, E = x.shape
    d = E // n_heads
    xf = x.reshape(S * B, E)
    qkv = xf @ params["in_proj_w"].T + params["in_proj_b"]
    qkv = qkv.reshape(S, B, 3 * E)
    q, k, v = qkv[..., :E], qkv[..., E:2 * E], qkv[..., 2 * E:]
    to_heads = lambda t: t.reshape(S, B * n_heads, d).transpose(1, 0, 2)
    qh, kh, vh = to_heads(q), to_heads(k), to_heads(v)
    s = jnp.einsum("bqd,bkd->bqk", qh, kh) / float(d) ** 0.5
    p = jax.nn.softmax(s, axis=-1)
    oh = jnp.einsum("bqk,bkd->bqd", p, vh)
    o = oh.transpose(1, 0, 2).reshape(S * B, E)
    attn_out = o @ params["out_proj_w"].T + params["out_proj_b"]

    def ln(y):
        mu = jnp.mean(y, axis=-1, keepdims=True)
        var = jnp.mean(jnp.square(y - mu), axis=-1, keepdims=True)
        return (y - mu) * jax.lax.rsqrt(var + 1e-5) * params["ln_g"] + params["ln_b"]

    x1 = ln(attn_out + xf)
    h = jnp.maximum(x1 @ params["w1"].T + params["b1"], 0.0)
    z = h @ params["w2"].T + params["b2"]
    return ln(z).reshape(S, B, E)


# ---------------------------------------------------------------------------

if __name__ == "__main__":
    # seq = n_pixels**2 = 16, batch = 2, n_features = 32, heads = 4, d_ff = 64
    S, B, E, H, FH = 16, 2, 32, 4, 64
    assert E % H == 0

    key = jax.random.PRNGKey(0)
    keys = jax.random.split(key, 11)
    params = {
        "in_proj_w":  0.1 * jax.random.normal(keys[0], (3 * E, E), jnp.float32),
        "in_proj_b":  0.1 * jax.random.normal(keys[1], (3 * E,), jnp.float32),
        "out_proj_w": 0.1 * jax.random.normal(keys[2], (E, E), jnp.float32),
        "out_proj_b": 0.1 * jax.random.normal(keys[3], (E,), jnp.float32),
        "ln_g": jnp.ones((E,), jnp.float32) + 0.05 * jax.random.normal(keys[4], (E,), jnp.float32),
        "ln_b": 0.05 * jax.random.normal(keys[5], (E,), jnp.float32),
        "w1":   0.1 * jax.random.normal(keys[6], (FH, E), jnp.float32),
        "b1":   0.1 * jax.random.normal(keys[7], (FH,), jnp.float32),
        "w2":   0.1 * jax.random.normal(keys[8], (E, FH), jnp.float32),
        "b2":   0.1 * jax.random.normal(keys[9], (E,), jnp.float32),
    }
    x = jax.random.normal(keys[10], (S, B, E), jnp.float32)

    prepped = prepare_params(params, H)        # one-time, outside the hot path

    fwd = jax.jit(attention_block_forward, static_argnums=2)
    out = jax.block_until_ready(fwd(x, prepped, H))
    ref = reference_forward(x, params, H)

    assert out.shape == (S, B, E)
    # 1e-3 tolerance: approx EUP reciprocal in the softmax denominator; all
    # other math is f32 with f32 accumulation.
    assert jnp.allclose(out, ref, atol=1e-3, rtol=1e-3), "Pallas output mismatch vs reference"
    print("KERNEL_OK")
</pallas_src>

<mosaic_0001>
module attributes {stable_mosaic.version = 11 : i64} {
  func.func @_fused_attention_block_kernel(%arg0: memref<16x2x32xf32, #tpu.memory_space<vmem>>, %arg1: memref<32x96xf32, #tpu.memory_space<vmem>>, %arg2: memref<1x96xf32, #tpu.memory_space<vmem>>, %arg3: memref<4x8x32xf32, #tpu.memory_space<vmem>>, %arg4: memref<1x32xf32, #tpu.memory_space<vmem>>, %arg5: memref<1x32xf32, #tpu.memory_space<vmem>>, %arg6: memref<1x32xf32, #tpu.memory_space<vmem>>, %arg7: memref<32x64xf32, #tpu.memory_space<vmem>>, %arg8: memref<1x64xf32, #tpu.memory_space<vmem>>, %arg9: memref<64x32xf32, #tpu.memory_space<vmem>>, %arg10: memref<1x32xf32, #tpu.memory_space<vmem>>, %arg11: memref<16x2x32xf32, #tpu.memory_space<vmem>>) attributes {dimension_semantics = [], scalar_prefetch = 0 : i64, scratch_operands = 0 : i64, tpu.core_type = #tpu.core_type<tc>} {
    %c0 = arith.constant 0 : index
    %c0_0 = arith.constant 0 : index
    %c0_1 = arith.constant 0 : index
    %0 = vector.load %arg0[%c0, %c0_0, %c0_1] : memref<16x2x32xf32, #tpu.memory_space<vmem>>, vector<16x2x32xf32>
    %1 = vector.shape_cast %0 : vector<16x2x32xf32> to vector<32x32xf32>
    %c0_2 = arith.constant 0 : index
    %c0_3 = arith.constant 0 : index
    %2 = vector.load %arg1[%c0_2, %c0_3] : memref<32x96xf32, #tpu.memory_space<vmem>>, vector<32x96xf32>
    %cst = arith.constant dense<0.000000e+00> : vector<32x96xf32>
    %3 = tpu.matmul %1, %2, %cst {dimension_numbers = #tpu.dot_dimension_numbers<[1], [0], [0], [1], [0, 0, 1, 1], [], []>} : vector<32x32xf32>, vector<32x96xf32>, vector<32x96xf32> -> vector<32x96xf32>
    %c0_4 = arith.constant 0 : index
    %c0_5 = arith.constant 0 : index
    %4 = vector.load %arg2[%c0_4, %c0_5] : memref<1x96xf32, #tpu.memory_space<vmem>>, vector<1x96xf32>
    %5 = vector.broadcast %4 : vector<1x96xf32> to vector<32x96xf32>
    %6 = arith.addf %3, %5 : vector<32x96xf32>
    %7 = vector.extract_strided_slice %6 {offsets = [0, 0], sizes = [32, 32], strides = [1, 1]} : vector<32x96xf32> to vector<32x32xf32>
    %8 = vector.extract_strided_slice %6 {offsets = [0, 32], sizes = [32, 32], strides = [1, 1]} : vector<32x96xf32> to vector<32x32xf32>
    %9 = vector.extract_strided_slice %6 {offsets = [0, 64], sizes = [32, 32], strides = [1, 1]} : vector<32x96xf32> to vector<32x32xf32>
    %10 = tpu.iota {dimensions = array<i32: 0>} : vector<32x32xi32>
    %c2_i32 = arith.constant 2 : i32
    %c0_i32 = arith.constant 0 : i32
    %11 = arith.cmpi eq, %c2_i32, %c0_i32 : i32
    %c1_i32 = arith.constant 1 : i32
    %12 = arith.select %11, %c1_i32, %c2_i32 : i32
    %13 = vector.broadcast %12 : i32 to vector<32x32xi32>
    %14 = arith.remsi %10, %13 : vector<32x32xi32>
    %c0_i32_6 = arith.constant 0 : i32
    %15 = vector.broadcast %c0_i32_6 : i32 to vector<32x32xi32>
    %16 = arith.cmpi ne, %14, %15 : vector<32x32xi32>
    %c0_i32_7 = arith.constant 0 : i32
    %17 = vector.broadcast %c0_i32_7 : i32 to vector<32x32xi32>
    %18 = arith.cmpi slt, %14, %17 : vector<32x32xi32>
    %c0_i32_8 = arith.constant 0 : i32
    %19 = arith.cmpi slt, %12, %c0_i32_8 : i32
    %20 = vector.broadcast %19 : i1 to vector<32x32xi1>
    %21 = vector.broadcast %20 : vector<32x32xi1> to vector<32x32xi1>
    %22 = arith.xori %18, %21 : vector<32x32xi1>
    %23 = arith.andi %22, %16 : vector<32x32xi1>
    %24 = vector.broadcast %12 : i32 to vector<32x32xi32>
    %25 = arith.addi %14, %24 : vector<32x32xi32>
    %26 = arith.select %23, %25, %14 : vector<32x32xi1>, vector<32x32xi32>
    %27 = tpu.iota {dimensions = array<i32: 1>} : vector<32x32xi32>
    %c2_i32_9 = arith.constant 2 : i32
    %c0_i32_10 = arith.constant 0 : i32
    %28 = arith.cmpi eq, %c2_i32_9, %c0_i32_10 : i32
    %c1_i32_11 = arith.constant 1 : i32
    %29 = arith.select %28, %c1_i32_11, %c2_i32_9 : i32
    %30 = vector.broadcast %29 : i32 to vector<32x32xi32>
    %31 = arith.remsi %27, %30 : vector<32x32xi32>
    %c0_i32_12 = arith.constant 0 : i32
    %32 = vector.broadcast %c0_i32_12 : i32 to vector<32x32xi32>
    %33 = arith.cmpi ne, %31, %32 : vector<32x32xi32>
    %c0_i32_13 = arith.constant 0 : i32
    %34 = vector.broadcast %c0_i32_13 : i32 to vector<32x32xi32>
    %35 = arith.cmpi slt, %31, %34 : vector<32x32xi32>
    %c0_i32_14 = arith.constant 0 : i32
    %36 = arith.cmpi slt, %29, %c0_i32_14 : i32
    %37 = vector.broadcast %36 : i1 to vector<32x32xi1>
    %38 = vector.broadcast %37 : vector<32x32xi1> to vector<32x32xi1>
    %39 = arith.xori %35, %38 : vector<32x32xi1>
    %40 = arith.andi %39, %33 : vector<32x32xi1>
    %41 = vector.broadcast %29 : i32 to vector<32x32xi32>
    %42 = arith.addi %31, %41 : vector<32x32xi32>
    %43 = arith.select %40, %42, %31 : vector<32x32xi1>, vector<32x32xi32>
    %44 = arith.cmpi eq, %26, %43 : vector<32x32xi32>
    %cst_15 = arith.constant 0.000000e+00 : f32
    %45 = vector.broadcast %cst_15 : f32 to vector<32x32xf32>
    %46 = vector.extract_strided_slice %7 {offsets = [0, 0], sizes = [32, 8], strides = [1, 1]} : vector<32x32xf32> to vector<32x8xf32>
    %47 = vector.extract_strided_slice %8 {offsets = [0, 0], sizes = [32, 8], strides = [1, 1]} : vector<32x32xf32> to vector<32x8xf32>
    %48 = vector.extract_strided_slice %9 {offsets = [0, 0], sizes = [32, 8], strides = [1, 1]} : vector<32x32xf32> to vector<32x8xf32>
    %cst_16 = arith.constant dense<0.000000e+00> : vector<32x32xf32>
    %49 = tpu.matmul %46, %47, %cst_16 {dimension_numbers = #tpu.dot_dimension_numbers<[1], [1], [0], [0], [0, 0, 1, 0], [], []>} : vector<32x8xf32>, vector<32x8xf32>, vector<32x32xf32> -> vector<32x32xf32>
    %cst_17 = arith.constant -1.000000e+30 : f32
    %50 = vector.broadcast %cst_17 : f32 to vector<32x32xf32>
    %51 = arith.select %44, %49, %50 : vector<32x32xi1>, vector<32x32xf32>
    %cst_18 = arith.constant dense<0xFF800000> : vector<32xf32>
    %52 = vector.multi_reduction <maximumf>, %51, %cst_18 [1] : vector<32x32xf32> to vector<32xf32>
    %53 = vector.shape_cast %52 : vector<32xf32> to vector<32x1xf32>
    %54 = vector.broadcast %53 : vector<32x1xf32> to vector<32x32xf32>
    %55 = arith.subf %51, %54 : vector<32x32xf32>
    %56 = math.exp %55 : vector<32x32xf32>
    %cst_19 = arith.constant dense<0.000000e+00> : vector<32xf32>
    %57 = vector.multi_reduction <add>, %56, %cst_19 [1] : vector<32x32xf32> to vector<32xf32>
    %58 = vector.shape_cast %57 : vector<32xf32> to vector<32x1xf32>
    %59 = tpu.reciprocal %58 {approx = true} : vector<32x1xf32> -> vector<32x1xf32>
    %60 = vector.broadcast %59 : vector<32x1xf32> to vector<32x32xf32>
    %61 = arith.mulf %56, %60 : vector<32x32xf32>
    %cst_20 = arith.constant dense<0.000000e+00> : vector<32x8xf32>
    %62 = tpu.matmul %61, %48, %cst_20 {dimension_numbers = #tpu.dot_dimension_numbers<[1], [0], [0], [1], [0, 0, 1, 1], [], []>} : vector<32x32xf32>, vector<32x8xf32>, vector<32x8xf32> -> vector<32x8xf32>
    %c0_21 = arith.constant 0 : index
    %c0_22 = arith.constant 0 : index
    %c0_23 = arith.constant 0 : index
    %63 = vector.load %arg3[%c0_21, %c0_22, %c0_23] : memref<4x8x32xf32, #tpu.memory_space<vmem>>, vector<1x8x32xf32>
    %64 = vector.shape_cast %63 : vector<1x8x32xf32> to vector<8x32xf32>
    %cst_24 = arith.constant dense<0.000000e+00> : vector<32x32xf32>
    %65 = tpu.matmul %62, %64, %cst_24 {dimension_numbers = #tpu.dot_dimension_numbers<[1], [0], [0], [1], [0, 0, 1, 1], [], []>} : vector<32x8xf32>, vector<8x32xf32>, vector<32x32xf32> -> vector<32x32xf32>
    %66 = arith.addf %45, %65 : vector<32x32xf32>
    %67 = vector.extract_strided_slice %7 {offsets = [0, 8], sizes = [32, 8], strides = [1, 1]} : vector<32x32xf32> to vector<32x8xf32>
    %68 = vector.extract_strided_slice %8 {offsets = [0, 8], sizes = [32, 8], strides = [1, 1]} : vector<32x32xf32> to vector<32x8xf32>
    %69 = vector.extract_strided_slice %9 {offsets = [0, 8], sizes = [32, 8], strides = [1, 1]} : vector<32x32xf32> to vector<32x8xf32>
    %cst_25 = arith.constant dense<0.000000e+00> : vector<32x32xf32>
    %70 = tpu.matmul %67, %68, %cst_25 {dimension_numbers = #tpu.dot_dimension_numbers<[1], [1], [0], [0], [0, 0, 1, 0], [], []>} : vector<32x8xf32>, vector<32x8xf32>, vector<32x32xf32> -> vector<32x32xf32>
    %cst_26 = arith.constant -1.000000e+30 : f32
    %71 = vector.broadcast %cst_26 : f32 to vector<32x32xf32>
    %72 = arith.select %44, %70, %71 : vector<32x32xi1>, vector<32x32xf32>
    %cst_27 = arith.constant dense<0xFF800000> : vector<32xf32>
    %73 = vector.multi_reduction <maximumf>, %72, %cst_27 [1] : vector<32x32xf32> to vector<32xf32>
    %74 = vector.shape_cast %73 : vector<32xf32> to vector<32x1xf32>
    %75 = vector.broadcast %74 : vector<32x1xf32> to vector<32x32xf32>
    %76 = arith.subf %72, %75 : vector<32x32xf32>
    %77 = math.exp %76 : vector<32x32xf32>
    %cst_28 = arith.constant dense<0.000000e+00> : vector<32xf32>
    %78 = vector.multi_reduction <add>, %77, %cst_28 [1] : vector<32x32xf32> to vector<32xf32>
    %79 = vector.shape_cast %78 : vector<32xf32> to vector<32x1xf32>
    %80 = tpu.reciprocal %79 {approx = true} : vector<32x1xf32> -> vector<32x1xf32>
    %81 = vector.broadcast %80 : vector<32x1xf32> to vector<32x32xf32>
    %82 = arith.mulf %77, %81 : vector<32x32xf32>
    %cst_29 = arith.constant dense<0.000000e+00> : vector<32x8xf32>
    %83 = tpu.matmul %82, %69, %cst_29 {dimension_numbers = #tpu.dot_dimension_numbers<[1], [0], [0], [1], [0, 0, 1, 1], [], []>} : vector<32x32xf32>, vector<32x8xf32>, vector<32x8xf32> -> vector<32x8xf32>
    %c1 = arith.constant 1 : index
    %c0_30 = arith.constant 0 : index
    %c0_31 = arith.constant 0 : index
    %84 = vector.load %arg3[%c1, %c0_30, %c0_31] : memref<4x8x32xf32, #tpu.memory_space<vmem>>, vector<1x8x32xf32>
    %85 = vector.shape_cast %84 : vector<1x8x32xf32> to vector<8x32xf32>
    %cst_32 = arith.constant dense<0.000000e+00> : vector<32x32xf32>
    %86 = tpu.matmul %83, %85, %cst_32 {dimension_numbers = #tpu.dot_dimension_numbers<[1], [0], [0], [1], [0, 0, 1, 1], [], []>} : vector<32x8xf32>, vector<8x32xf32>, vector<32x32xf32> -> vector<32x32xf32>
    %87 = arith.addf %66, %86 : vector<32x32xf32>
    %88 = vector.extract_strided_slice %7 {offsets = [0, 16], sizes = [32, 8], strides = [1, 1]} : vector<32x32xf32> to vector<32x8xf32>
    %89 = vector.extract_strided_slice %8 {offsets = [0, 16], sizes = [32, 8], strides = [1, 1]} : vector<32x32xf32> to vector<32x8xf32>
    %90 = vector.extract_strided_slice %9 {offsets = [0, 16], sizes = [32, 8], strides = [1, 1]} : vector<32x32xf32> to vector<32x8xf32>
    %cst_33 = arith.constant dense<0.000000e+00> : vector<32x32xf32>
    %91 = tpu.matmul %88, %89, %cst_33 {dimension_numbers = #tpu.dot_dimension_numbers<[1], [1], [0], [0], [0, 0, 1, 0], [], []>} : vector<32x8xf32>, vector<32x8xf32>, vector<32x32xf32> -> vector<32x32xf32>
    %cst_34 = arith.constant -1.000000e+30 : f32
    %92 = vector.broadcast %cst_34 : f32 to vector<32x32xf32>
    %93 = arith.select %44, %91, %92 : vector<32x32xi1>, vector<32x32xf32>
    %cst_35 = arith.constant dense<0xFF800000> : vector<32xf32>
    %94 = vector.multi_reduction <maximumf>, %93, %cst_35 [1] : vector<32x32xf32> to vector<32xf32>
    %95 = vector.shape_cast %94 : vector<32xf32> to vector<32x1xf32>
    %96 = vector.broadcast %95 : vector<32x1xf32> to vector<32x32xf32>
    %97 = arith.subf %93, %96 : vector<32x32xf32>
    %98 = math.exp %97 : vector<32x32xf32>
    %cst_36 = arith.constant dense<0.000000e+00> : vector<32xf32>
    %99 = vector.multi_reduction <add>, %98, %cst_36 [1] : vector<32x32xf32> to vector<32xf32>
    %100 = vector.shape_cast %99 : vector<32xf32> to vector<32x1xf32>
    %101 = tpu.reciprocal %100 {approx = true} : vector<32x1xf32> -> vector<32x1xf32>
    %102 = vector.broadcast %101 : vector<32x1xf32> to vector<32x32xf32>
    %103 = arith.mulf %98, %102 : vector<32x32xf32>
    %cst_37 = arith.constant dense<0.000000e+00> : vector<32x8xf32>
    %104 = tpu.matmul %103, %90, %cst_37 {dimension_numbers = #tpu.dot_dimension_numbers<[1], [0], [0], [1], [0, 0, 1, 1], [], []>} : vector<32x32xf32>, vector<32x8xf32>, vector<32x8xf32> -> vector<32x8xf32>
    %c2 = arith.constant 2 : index
    %c0_38 = arith.constant 0 : index
    %c0_39 = arith.constant 0 : index
    %105 = vector.load %arg3[%c2, %c0_38, %c0_39] : memref<4x8x32xf32, #tpu.memory_space<vmem>>, vector<1x8x32xf32>
    %106 = vector.shape_cast %105 : vector<1x8x32xf32> to vector<8x32xf32>
    %cst_40 = arith.constant dense<0.000000e+00> : vector<32x32xf32>
    %107 = tpu.matmul %104, %106, %cst_40 {dimension_numbers = #tpu.dot_dimension_numbers<[1], [0], [0], [1], [0, 0, 1, 1], [], []>} : vector<32x8xf32>, vector<8x32xf32>, vector<32x32xf32> -> vector<32x32xf32>
    %108 = arith.addf %87, %107 : vector<32x32xf32>
    %109 = vector.extract_strided_slice %7 {offsets = [0, 24], sizes = [32, 8], strides = [1, 1]} : vector<32x32xf32> to vector<32x8xf32>
    %110 = vector.extract_strided_slice %8 {offsets = [0, 24], sizes = [32, 8], strides = [1, 1]} : vector<32x32xf32> to vector<32x8xf32>
    %111 = vector.extract_strided_slice %9 {offsets = [0, 24], sizes = [32, 8], strides = [1, 1]} : vector<32x32xf32> to vector<32x8xf32>
    %cst_41 = arith.constant dense<0.000000e+00> : vector<32x32xf32>
    %112 = tpu.matmul %109, %110, %cst_41 {dimension_numbers = #tpu.dot_dimension_numbers<[1], [1], [0], [0], [0, 0, 1, 0], [], []>} : vector<32x8xf32>, vector<32x8xf32>, vector<32x32xf32> -> vector<32x32xf32>
    %cst_42 = arith.constant -1.000000e+30 : f32
    %113 = vector.broadcast %cst_42 : f32 to vector<32x32xf32>
    %114 = arith.select %44, %112, %113 : vector<32x32xi1>, vector<32x32xf32>
    %cst_43 = arith.constant dense<0xFF800000> : vector<32xf32>
    %115 = vector.multi_reduction <maximumf>, %114, %cst_43 [1] : vector<32x32xf32> to vector<32xf32>
    %116 = vector.shape_cast %115 : vector<32xf32> to vector<32x1xf32>
    %117 = vector.broadcast %116 : vector<32x1xf32> to vector<32x32xf32>
    %118 = arith.subf %114, %117 : vector<32x32xf32>
    %119 = math.exp %118 : vector<32x32xf32>
    %cst_44 = arith.constant dense<0.000000e+00> : vector<32xf32>
    %120 = vector.multi_reduction <add>, %119, %cst_44 [1] : vector<32x32xf32> to vector<32xf32>
    %121 = vector.shape_cast %120 : vector<32xf32> to vector<32x1xf32>
    %122 = tpu.reciprocal %121 {approx = true} : vector<32x1xf32> -> vector<32x1xf32>
    %123 = vector.broadcast %122 : vector<32x1xf32> to vector<32x32xf32>
    %124 = arith.mulf %119, %123 : vector<32x32xf32>
    %cst_45 = arith.constant dense<0.000000e+00> : vector<32x8xf32>
    %125 = tpu.matmul %124, %111, %cst_45 {dimension_numbers = #tpu.dot_dimension_numbers<[1], [0], [0], [1], [0, 0, 1, 1], [], []>} : vector<32x32xf32>, vector<32x8xf32>, vector<32x8xf32> -> vector<32x8xf32>
    %c3 = arith.constant 3 : index
    %c0_46 = arith.constant 0 : index
    %c0_47 = arith.constant 0 : index
    %126 = vector.load %arg3[%c3, %c0_46, %c0_47] : memref<4x8x32xf32, #tpu.memory_space<vmem>>, vector<1x8x32xf32>
    %127 = vector.shape_cast %126 : vector<1x8x32xf32> to vector<8x32xf32>
    %cst_48 = arith.constant dense<0.000000e+00> : vector<32x32xf32>
    %128 = tpu.matmul %125, %127, %cst_48 {dimension_numbers = #tpu.dot_dimension_numbers<[1], [0], [0], [1], [0, 0, 1, 1], [], []>} : vector<32x8xf32>, vector<8x32xf32>, vector<32x32xf32> -> vector<32x32xf32>
    %129 = arith.addf %108, %128 : vector<32x32xf32>
    %c0_49 = arith.constant 0 : index
    %c0_50 = arith.constant 0 : index
    %130 = vector.load %arg4[%c0_49, %c0_50] : memref<1x32xf32, #tpu.memory_space<vmem>>, vector<1x32xf32>
    %131 = vector.broadcast %130 : vector<1x32xf32> to vector<32x32xf32>
    %132 = arith.addf %129, %131 : vector<32x32xf32>
    %133 = arith.addf %132, %1 : vector<32x32xf32>
    %cst_51 = arith.constant dense<0.000000e+00> : vector<32xf32>
    %134 = vector.multi_reduction <add>, %133, %cst_51 [1] : vector<32x32xf32> to vector<32xf32>
    %135 = vector.shape_cast %134 : vector<32xf32> to vector<32x1xf32>
    %cst_52 = arith.constant 3.200000e+01 : f32
    %136 = vector.broadcast %cst_52 : f32 to vector<32x1xf32>
    %137 = arith.divf %135, %136 : vector<32x1xf32>
    %138 = vector.broadcast %137 : vector<32x1xf32> to vector<32x32xf32>
    %139 = arith.subf %133, %138 : vector<32x32xf32>
    %140 = arith.mulf %139, %139 : vector<32x32xf32>
    %cst_53 = arith.constant dense<0.000000e+00> : vector<32xf32>
    %141 = vector.multi_reduction <add>, %140, %cst_53 [1] : vector<32x32xf32> to vector<32xf32>
    %142 = vector.shape_cast %141 : vector<32xf32> to vector<32x1xf32>
    %cst_54 = arith.constant 3.200000e+01 : f32
    %143 = vector.broadcast %cst_54 : f32 to vector<32x1xf32>
    %144 = arith.divf %142, %143 : vector<32x1xf32>
    %145 = vector.broadcast %137 : vector<32x1xf32> to vector<32x32xf32>
    %146 = arith.subf %133, %145 : vector<32x32xf32>
    %cst_55 = arith.constant 9.99999974E-6 : f32
    %147 = vector.broadcast %cst_55 : f32 to vector<32x1xf32>
    %148 = arith.addf %144, %147 : vector<32x1xf32>
    %149 = math.rsqrt %148 : vector<32x1xf32>
    %150 = vector.broadcast %149 : vector<32x1xf32> to vector<32x32xf32>
    %151 = arith.mulf %146, %150 : vector<32x32xf32>
    %c0_56 = arith.constant 0 : index
    %c0_57 = arith.constant 0 : index
    %152 = vector.load %arg5[%c0_56, %c0_57] : memref<1x32xf32, #tpu.memory_space<vmem>>, vector<1x32xf32>
    %153 = vector.broadcast %152 : vector<1x32xf32> to vector<32x32xf32>
    %154 = arith.mulf %151, %153 : vector<32x32xf32>
    %c0_58 = arith.constant 0 : index
    %c0_59 = arith.constant 0 : index
    %155 = vector.load %arg6[%c0_58, %c0_59] : memref<1x32xf32, #tpu.memory_space<vmem>>, vector<1x32xf32>
    %156 = vector.broadcast %155 : vector<1x32xf32> to vector<32x32xf32>
    %157 = arith.addf %154, %156 : vector<32x32xf32>
    %c0_60 = arith.constant 0 : index
    %c0_61 = arith.constant 0 : index
    %158 = vector.load %arg7[%c0_60, %c0_61] : memref<32x64xf32, #tpu.memory_space<vmem>>, vector<32x64xf32>
    %cst_62 = arith.constant dense<0.000000e+00> : vector<32x64xf32>
    %159 = tpu.matmul %157, %158, %cst_62 {dimension_numbers = #tpu.dot_dimension_numbers<[1], [0], [0], [1], [0, 0, 1, 1], [], []>} : vector<32x32xf32>, vector<32x64xf32>, vector<32x64xf32> -> vector<32x64xf32>
    %c0_63 = arith.constant 0 : index
    %c0_64 = arith.constant 0 : index
    %160 = vector.load %arg8[%c0_63, %c0_64] : memref<1x64xf32, #tpu.memory_space<vmem>>, vector<1x64xf32>
    %161 = vector.broadcast %160 : vector<1x64xf32> to vector<32x64xf32>
    %162 = arith.addf %159, %161 : vector<32x64xf32>
    %cst_65 = arith.constant 0.000000e+00 : f32
    %163 = vector.broadcast %cst_65 : f32 to vector<32x64xf32>
    %164 = arith.maximumf %162, %163 : vector<32x64xf32>
    %c0_66 = arith.constant 0 : index
    %c0_67 = arith.constant 0 : index
    %165 = vector.load %arg9[%c0_66, %c0_67] : memref<64x32xf32, #tpu.memory_space<vmem>>, vector<64x32xf32>
    %cst_68 = arith.constant dense<0.000000e+00> : vector<32x32xf32>
    %166 = tpu.matmul %164, %165, %cst_68 {dimension_numbers = #tpu.dot_dimension_numbers<[1], [0], [0], [1], [0, 0, 1, 1], [], []>} : vector<32x64xf32>, vector<64x32xf32>, vector<32x32xf32> -> vector<32x32xf32>
    %c0_69 = arith.constant 0 : index
    %c0_70 = arith.constant 0 : index
    %167 = vector.load %arg10[%c0_69, %c0_70] : memref<1x32xf32, #tpu.memory_space<vmem>>, vector<1x32xf32>
    %168 = vector.broadcast %167 : vector<1x32xf32> to vector<32x32xf32>
    %169 = arith.addf %166, %168 : vector<32x32xf32>
    %cst_71 = arith.constant dense<0.000000e+00> : vector<32xf32>
    %170 = vector.multi_reduction <add>, %169, %cst_71 [1] : vector<32x32xf32> to vector<32xf32>
    %171 = vector.shape_cast %170 : vector<32xf32> to vector<32x1xf32>
    %cst_72 = arith.constant 3.200000e+01 : f32
    %172 = vector.broadcast %cst_72 : f32 to vector<32x1xf32>
    %173 = arith.divf %171, %172 : vector<32x1xf32>
    %174 = vector.broadcast %173 : vector<32x1xf32> to vector<32x32xf32>
    %175 = arith.subf %169, %174 : vector<32x32xf32>
    %176 = arith.mulf %175, %175 : vector<32x32xf32>
    %cst_73 = arith.constant dense<0.000000e+00> : vector<32xf32>
    %177 = vector.multi_reduction <add>, %176, %cst_73 [1] : vector<32x32xf32> to vector<32xf32>
    %178 = vector.shape_cast %177 : vector<32xf32> to vector<32x1xf32>
    %cst_74 = arith.constant 3.200000e+01 : f32
    %179 = vector.broadcast %cst_74 : f32 to vector<32x1xf32>
    %180 = arith.divf %178, %179 : vector<32x1xf32>
    %181 = vector.broadcast %173 : vector<32x1xf32> to vector<32x32xf32>
    %182 = arith.subf %169, %181 : vector<32x32xf32>
    %cst_75 = arith.constant 9.99999974E-6 : f32
    %183 = vector.broadcast %cst_75 : f32 to vector<32x1xf32>
    %184 = arith.addf %180, %183 : vector<32x1xf32>
    %185 = math.rsqrt %184 : vector<32x1xf32>
    %186 = vector.broadcast %185 : vector<32x1xf32> to vector<32x32xf32>
    %187 = arith.mulf %182, %186 : vector<32x32xf32>
    %c0_76 = arith.constant 0 : index
    %c0_77 = arith.constant 0 : index
    %188 = vector.load %arg5[%c0_76, %c0_77] : memref<1x32xf32, #tpu.memory_space<vmem>>, vector<1x32xf32>
    %189 = vector.broadcast %188 : vector<1x32xf32> to vector<32x32xf32>
    %190 = arith.mulf %187, %189 : vector<32x32xf32>
    %c0_78 = arith.constant 0 : index
    %c0_79 = arith.constant 0 : index
    %191 = vector.load %arg6[%c0_78, %c0_79] : memref<1x32xf32, #tpu.memory_space<vmem>>, vector<1x32xf32>
    %192 = vector.broadcast %191 : vector<1x32xf32> to vector<32x32xf32>
    %193 = arith.addf %190, %192 : vector<32x32xf32>
    %194 = vector.shape_cast %193 : vector<32x32xf32> to vector<16x2x32xf32>
    %c0_80 = arith.constant 0 : index
    %c0_81 = arith.constant 0 : index
    %c0_82 = arith.constant 0 : index
    %195 = vector.load %arg11[%c0_80, %c0_81, %c0_82] : memref<16x2x32xf32, #tpu.memory_space<vmem>>, vector<16x2x32xf32>
    tpu.vector_store %arg11[%c0_80, %c0_81, %c0_82], %194 {strides = array<i32>} : memref<16x2x32xf32, #tpu.memory_space<vmem>>, vector<16x2x32xf32>,
    return
  }
}

</mosaic_0001>

<bundles_post_ra>
// kernel: attention_block_forward.1
= control target key start
LH: loop header
LB: loop body
LE: loop exit
PB: predicated region body
PF: predicated region fallthrough
CT: control target
= control target key end

     0   :  { %16 = vsyncpa [#allocation3], 0  ;;  %s3706_s0 = inlined_call_operand.vmem [shape: f32[16,2,32], index: 0, kind: input, shape index: {}]   ;;  %s3707_s1 = inlined_call_operand.vmem [shape: f32[32,96], index: 1, kind: input, shape index: {}]   ;;  %s3708_s2 = inlined_call_operand.vmem [shape: f32[1,96], index: 2, kind: input, shape index: {}]   ;;  %s3709_s3 = inlined_call_operand.vmem [shape: f32[4,8,32], index: 3, kind: input, shape index: {}]   ;;  %s3710_s4 = inlined_call_operand.vmem [shape: f32[1,32], index: 4, kind: input, shape index: {}]   ;;  %s3711_s5 = inlined_call_operand.vmem [shape: f32[1,32], index: 5, kind: input, shape index: {}]   ;;  %s3712_s6 = inlined_call_operand.vmem [shape: f32[1,32], index: 6, kind: input, shape index: {}]   ;;  %s3713_s7 = inlined_call_operand.hbm [shape: f32[32,64], index: 7, kind: input, shape index: {}]   ;;  %s3714_s8 = inlined_call_operand.hbm [shape: f32[1,64], index: 8, kind: input, shape index: {}]   ;;  %s3715_s9 = inlined_call_operand.vmem [shape: f32[64,32], index: 9, kind: input, shape index: {}]   ;;  %s3716_s10 = inlined_call_operand.vmem [shape: f32[1,32], index: 10, kind: input, shape index: {}]   ;;  %s3717_s11 = inlined_call_operand.hbm [shape: f32[16,2,32], index: 11, kind: output, shape index: {}]  }
   0x1   :  { %17 = vsyncpa [#allocation6], 0 }
   0x2   :  { %18 = vsyncpa [#allocation4], 0  ;;  %s3105_s17 = smov [#allocation2]   ;;  %s3033_s21 = scalar_lea.hbm %s3713_s7, 512 }
   0x3   :  { %s38_s18 = sshll.u32 %s3105_s17, 4  ;;  %p3034_p0 = scmp.ne.s32.totalorder %s3713_s7, %s3033_s21  ;;  %s39_s18 = int_to_ptr.vmem [resolvable:$true] %s38_s18 }
   0x4   :  { %p3037_p1 = scmp.lt.u32.totalorder %s3033_s21, %s3713_s7 }
   0x6   :  { %p3039_p2 = pnand %p3037_p1, %p3034_p0 }
   0x8   :  { %3042 = shalt.err (!%p3039_p2)
}
   0x9   :  { %s3043_s26 = scalar_lea.vmem %s39_s18, 512  ;;  %p3048_p4 = scmp.lt.s32.totalorder %s39_s18, %s39_s18 }
   0xa   :  { %p3044_p3 = scmp.ne.s32.totalorder %s39_s18, %s3043_s26  ;;  %p3049_p5 = scmp.lt.s32.totalorder %s3043_s26, %s3043_s26 }
   0xc   :  { %p3050_p6 = por %p3049_p5, %p3048_p4 }
   0xe   :  { %p3051_p7 = pnand %p3050_p6, %p3044_p3 }
  0x10   :  { %3054 = shalt.err (!%p3051_p7)
}
  0x11   :  { %s3106_s27 = smov 128   ;;  %s3107_s28 = smov 8  }
  0x12   :  { %44 = dma.hbm_to_vmem [thread:$0]  %s3713_s7, 512, %s39_s18, [#allocation3], %s3106_s27, %s3106_s27, %s3107_s28  }
  0x13   :  { %s3108_s12 = smov [#allocation5]   ;;  %s3055_s16 = scalar_lea.hbm %s3714_s8, 16 }
  0x14   :  { %s51_s13 = sshll.u32 %s3108_s12, 4  ;;  %p3056_p8 = scmp.ne.s32.totalorder %s3714_s8, %s3055_s16  ;;  %s52_s13 = int_to_ptr.vmem [resolvable:$true] %s51_s13 }
  0x15   :  { %p3059_p9 = scmp.lt.u32.totalorder %s3055_s16, %s3714_s8 }
  0x17   :  { %p3061_p10 = pnand %p3059_p9, %p3056_p8 }
  0x19   :  { %3064 = shalt.err (!%p3061_p10)
}
  0x1a   :  { %s3065_s22 = scalar_lea.vmem %s52_s13, 16  ;;  %s3069_s7 = scalar_lea.vmem %s52_s13, 32 }
  0x1b   :  { %p3066_p11 = scmp.ne.s32.totalorder %s52_s13, %s3065_s22  ;;  %p3070_p12 = scmp.lt.s32.totalorder %s52_s13, %s52_s13 }
  0x1c   :  { %p3071_p13 = scmp.lt.s32.totalorder %s3069_s7, %s3065_s22 }
  0x1e   :  { %p3072_p0 = por %p3071_p13, %p3070_p12 }
  0x20   :  { %p3073_p1 = pnand %p3072_p0, %p3066_p11 }
  0x22   :  { %3076 = shalt.err (!%p3073_p1)
}
  0x23   :  { %54 = dma.hbm_to_vmem [thread:$0]  %s3714_s8, 16, %s52_s13, [#allocation6]  }
  0x24   :  { %3099 = dma.done.wait [#allocation3], 512  }
  0x25   :  { %3100 = vsyncadd [#allocation3], 4294966784 }
  0x26   :  { %3101 = dma.done.wait [#allocation6], 16  }
  0x27   :  { %3102 = vsyncadd [#allocation6], 4294967280  ;;  %v113_v0 = vlaneseq  ;;  %v3109_v1 = vmov 1983009808   ;;  %v81_v5 = vld [vmem:[%s3707_s1] sm:$0xff]  ;;  %v82_v6 = vld [vmem:[%s3707_s1 + $0x8] sm:$0xff] }
  0x28   :  { %v111_v2 = vunpack.c.l.s4 %v3109_v1  ;;  %v83_v7 = vld [vmem:[%s3707_s1 + $0x10] sm:$0xff]  ;;  %v2730_v9 = vpack.c.bf16 %v82_v6, %v81_v5  ;;  %v84_v10 = vld [vmem:[%s3707_s1 + $0x18] sm:$0xff]  ;;  %v65_v11 = vld [vmem:[%s3706_s0] sm:$0x3]  ;;  %vm176_vm0 = vcmask 261120   ;;  %vm353_vm1 = vcmask 64512  }
  0x29   :  { %v3209_v4 = vshrl.u32 %v113_v0, 7  ;;  %v66_v12 = vld [vmem:[%s3706_s0 + $0x2] sm:$0x3]  ;;  %v2734_v13 = vpack.c.bf16 %v84_v10, %v83_v7  ;;  %v67_v14 = vld [vmem:[%s3706_s0 + $0x4] sm:$0x3]  ;;  %s3110_s7 = smov 96   ;;  %vm3323_vm2 = vmpackc.low %vm353_vm1, %vm353_vm1 }
  0x2a   :  { %v112_v3 = vunpack.c.0.s8 %v111_v2  ;;  %v68_v15 = vld [vmem:[%s3706_s0 + $0x6] sm:$0x3]  ;;  %v108_v16 = vcombine.low %v65_v11, %v66_v12  ;;  %v69_v17 = vld [vmem:[%s3706_s0 + $0x8] sm:$0x3]  ;;  %2731 = vmatprep.subr.bf16.mxu1 %v2730_v9  ;;  %v70_v19 = vld [vmem:[%s3706_s0 + $0xa] sm:$0x3] }
  0x2b   :  { %v109_v18 = vcombine.low %v67_v14, %v68_v15  ;;  %v71_v20 = vld [vmem:[%s3706_s0 + $0xc] sm:$0x3]  ;;  %v72_v21 = vld [vmem:[%s3706_s0 + $0xe] sm:$0x3]  ;;  %2733 = vmatpush3.bf16.msra.mxu1 %v2730_v9  ;;  %v125_v23 = vcombine.low %v69_v17, %v70_v19  ;;  %v73_v25 = vld [vmem:[%s3706_s0 + $0x10] sm:$0x3] }
  0x2c   :  { %v3221_v8 = vsub.s32 %v112_v3, %v3209_v4  ;;  %v126_v24 = vcombine.low %v71_v20, %v72_v21  ;;  %v74_v26 = vld [vmem:[%s3706_s0 + $0x12] sm:$0x3]  ;;  %v75_v27 = vld [vmem:[%s3706_s0 + $0x14] sm:$0x3]  ;;  %2735 = vmatprep.subr.bf16.mxu1 %v2734_v13  ;;  %v76_v29 = vld [vmem:[%s3706_s0 + $0x16] sm:$0x3] }
  0x2d   :  { %v142_v30 = vcombine.low %v73_v25, %v74_v26  ;;  %v77_v31 = vld [vmem:[%s3706_s0 + $0x18] sm:$0x3]  ;;  %v78_v32 = vld [vmem:[%s3706_s0 + $0x1a] sm:$0x3]  ;;  %v143_v35 = vcombine.low %v75_v27, %v76_v29  ;;  %v79_v36 = vld [vmem:[%s3706_s0 + $0x1c] sm:$0x3] }
  0x2e   :  { %v116_v22 = vrot.slane %v108_v16, %v3221_v8  ;;  %v123_v28 = vrot.slane %v109_v18, %v3221_v8  ;;  %v133_v33 = vrot.slane %v125_v23, %v3221_v8  ;;  %v140_v34 = vrot.slane %v126_v24, %v3221_v8  ;;  %v80_v37 = vld [vmem:[%s3706_s0 + $0x1e] sm:$0x3]  ;;  %v2339_v48 = vld [vmem:[%s3708_s2] ss:$0 sm:$0xff]  ;;  %s3111_s2 = smov 64   ;;  %s3112_s18 = smov 88  }
  0x2f   :  { %v159_v38 = vcombine.low %v77_v31, %v78_v32  ;;  %v150_v40 = vrot.slane %v142_v30, %v3221_v8  ;;  %v160_v41 = vcombine.low %v79_v36, %v80_v37  ;;  %2737 = vmatpush3.bf16.msra.mxu1 %v2734_v13  ;;  %v157_v43 = vrot.slane %v143_v35, %v3221_v8  ;;  %s3113_s23 = smov 120   ;;  %s3114_s24 = smov 80  }
  0x30   :  { %v3278_v39 = vcombine.low %v116_v22, %v123_v28  ;;  %v3281_v42 = vcombine.low %v133_v33, %v140_v34  ;;  %v272_v6 = vadd.s32 8, %v3209_v4  ;;  %v324_v7 = vand.u32 127, %v113_v0  ;;  %s3115_s25 = smov 112   ;;  %s3116_s26 = smov 56   ;;  %v2389_v22 = vld [vmem:[%s3709_s3 + $0x10] sm:$0xff] }
  0x31   :  { %v167_v44 = vrot.slane %v159_v38, %v3221_v8  ;;  %v174_v45 = vrot.slane %v160_v41, %v3221_v8  ;;  %v3288_v46 = vcombine.low %v150_v40, %v157_v43  ;;  %v273_v11 = vadd.s32 16, %v3209_v4  ;;  %s3117_s27 = smov 72   ;;  %s3118_s8 = smov 104  }
  0x32   :  { %2544 = vmatprep.mubr.msk.f32.mxu1 %vm176_vm0, %v3278_v39  ;;  %v286_v9 = vand.u32 1, %v272_v6  ;;  %v329_v10 = vand.u32 1, %v324_v7  ;;  %v279_v12 = vand.u32 1, %v3209_v4  ;;  %v274_v13 = vadd.s32 24, %v3209_v4  ;;  %s3119_s30 = smov 48   ;;  %s3120_s16 = smov 40  }
  0x33   :  { %2545 = vmatmul.mubr.msk.f32.vlgmr.msra.gmra.mrb[0].mxu1 %vm176_vm0, %v3281_v42  ;;  %v3292_v47 = vcombine.low %v167_v44, %v174_v45  ;;  %v293_v15 = vand.u32 1, %v273_v11  ;;  %vm2058_vm7 = vcmask 523264   ;;  %vm2304_vm8 = vcmask 254976  }
  0x34   :  { %2547 = vmatprep.mubr.msk.f32.mxu1 %vm176_vm0, %v3288_v46  ;;  %vm3346_vm3 = vcmp.eq.s32.totalorder %v286_v9, %v329_v10  ;;  %vm3350_vm4 = vcmp.eq.s32.totalorder %v279_v12, %v329_v10  ;;  %v300_v18 = vand.u32 1, %v274_v13 }
  0x35   :  { %vm3359_vm5 = vcmp.eq.s32.totalorder %v293_v15, %v329_v10 }
  0x36   :  { %vm3363_vm6 = vcmp.eq.s32.totalorder %v300_v18, %v329_v10 }
  0x37   :  { %2548 = vmatmul.mubr.msk.f32.gmra.mrb[2].mxu1 %vm176_vm0, %v3292_v47 }
 0x106   :  { %v2546_v49 = vpop.f32.mrb[0].mxu1 }
 0x107   :  { %v3301_v50 = vadd.f32 %v2546_v49, %v2339_v48  ;;  %v251_v51 = vpop.f32.mrb[1].mxu1 }
 0x108   :  { %v3303_v52 = vadd.f32 %v2339_v48, %v251_v51 }
 0x10a   :  { %2558 = vmatprep.mubr.msk.f32.mxu1 %vm353_vm1, %v3303_v52  ;;  %v3309_v53 = vpack.i.bf16 %v3301_v50, %v3303_v52  ;;  %v2549_v54 = vpop.f32.mrb[2].mxu1 }
 0x10b   :  { %v3311_v55 = vadd.f32 %v2549_v54, %v2339_v48  ;;  %v261_v56 = vpop.f32.mrb[3].mxu1 }
 0x10c   :  { %2874 = vrot.lane.b32.xlu0 %v3309_v53, %s3110_s7  ;;  %v3314_v57 = vadd.f32 %v2339_v48, %v261_v56 }
 0x10e   :  { %v3318_v58 = vpack.i.bf16 %v3311_v55, %v3314_v57 }
 0x110   :  { %2879 = vrot.lane.b32.xlu0 %v3318_v58, %s3110_s7 }
 0x17e   :  { %v2875_v59 = vpop.permute.xlu0 %2874 }
 0x17f   :  { %v2877_v60 = vunpack.i.h.bf16 %v2875_v59  ;;  %v2876_v61 = vunpack.i.l.bf16 %v2875_v59 }
 0x181   :  { %v2738_v63 = vpack.c.bf16 %v2877_v60, %v2876_v61 }
 0x182   :  { %v2880_v1 = vpop.permute.xlu0 %2879 }
 0x183   :  { %2740 = vmatprep.subr.msk.bf16.mxu1 %vm3323_vm2, %v2738_v63  ;;  %v2882_v2 = vunpack.i.h.bf16 %v2880_v1  ;;  %v2881_v3 = vunpack.i.l.bf16 %v2880_v1 }
 0x184   :  { %2743 = vmatpush3.bf16.xpose.msk.msra.mxu1 %vm3323_vm2, %v2738_v63 }
 0x185   :  { %v2744_v5 = vpack.c.bf16 %v2882_v2, %v2881_v3 }
 0x187   :  { %2746 = vmatprep.subr.msk.bf16.mxu1 %vm3323_vm2, %v2744_v5 }
 0x18c   :  { %2749 = vmatpush3.bf16.xpose.msk.msra.mxu1 %vm3323_vm2, %v2744_v5 }
 0x193   :  { %2559 = vmatmul.mubr.msk.f32.vlgmr.msra.gmra.mrb[4].mxu1 %vm353_vm1, %v3301_v50 }
 0x194   :  { %2561 = vmatprep.mubr.msk.f32.mxu1 %vm353_vm1, %v3314_v57 }
 0x197   :  { %2562 = vmatmul.mubr.msk.f32.gmra.mrb[6].mxu1 %vm353_vm1, %v3311_v55 }
 0x266   :  { %v2560_v16 = vpop.f32.mrb[4].mxu1 }
 0x267   :  { %v456_v0 = vsel %vm3346_vm3, %v2560_v16, -1e+30  ;;  %v436_v19 = vpop.f32.mrb[5].mxu1 }
 0x268   :  { %v462_v20 = vsel %vm176_vm0, %v456_v0, -inf  ;;  %v455_v4 = vsel %vm3350_vm4, %v436_v19, -1e+30 }
 0x269   :  { %463 = vmax.xlane.f32.xlu1 %v462_v20  ;;  %v459_v26 = vsel %vm176_vm0, %v455_v4, -inf }
 0x26a   :  { %v2563_v23 = vpop.f32.mrb[6].mxu1 }
 0x26b   :  { %v446_v24 = vpop.f32.mrb[7].mxu1  ;;  %v458_v27 = vsel %vm3363_vm6, %v2563_v23, -1e+30 }
 0x26c   :  { %v457_v25 = vsel %vm3359_vm5, %v446_v24, -1e+30  ;;  %v468_v29 = vsel %vm176_vm0, %v458_v27, -inf }
 0x26d   :  { %460 = vmax.xlane.f32.xlu1 %v459_v26  ;;  %v465_v28 = vsel %vm176_vm0, %v457_v25, -inf }
 0x26e   :  { %466 = vmax.xlane.f32.xlu0 %v465_v28 }
 0x271   :  { %469 = vmax.xlane.f32.xlu1 %v468_v29 }
 0x282   :  { %2884 = vrot.lane.b32.xlu1 %v3309_v53, %s3111_s2 }
 0x284   :  { %2889 = vrot.lane.b32.xlu0 %v3318_v58, %s3111_s2 }
 0x286   :  { %2894 = vrot.lane.b32.xlu1 %v3309_v53, %s3112_s18 }
 0x288   :  { %617 = vrot.lane.b32.xlu0 %v3314_v57, %s3113_s23 }
 0x28a   :  { %2899 = vrot.lane.b32.xlu1 %v3318_v58, %s3112_s18 }
 0x28c   :  { %2904 = vrot.lane.b32.xlu0 %v3309_v53, %s3114_s24 }
 0x28e   :  { %613 = vrot.lane.b32.xlu1 %v3303_v52, %s3113_s23 }
 0x290   :  { %1083 = vrot.lane.b32.xlu0 %v3303_v52, %s3115_s25 }
 0x294   :  { %1087 = vrot.lane.b32.xlu0 %v3314_v57, %s3115_s25 }
 0x2f6   :  { %v464_v30 = vpop.xlane.xlu1 %463 }
 0x2f7   :  { %v472_v31 = vsub.f32 %v456_v0, %v464_v30 }
 0x2f9   :  { %v477_v32 = vmul.f32 1.442695, %v472_v31 }
 0x2fa   :  { %v461_v33 = vpop.xlane.xlu1 %460 }
 0x2fb   :  { %2953 = vpow2.f32 %v477_v32  ;;  %v471_v34 = vsub.f32 %v455_v4, %v461_v33  ;;  %v467_v35 = vpop.xlane.xlu0 %466 }
 0x2fc   :  { %v473_v3 = vsub.f32 %v457_v25, %v467_v35 }
 0x2fd   :  { %v475_v36 = vmul.f32 1.442695, %v471_v34 }
 0x2fe   :  { %v470_v37 = vpop.xlane.xlu1 %469  ;;  %v479_v6 = vmul.f32 1.442695, %v473_v3 }
 0x2ff   :  { %2955 = vpow2.f32 %v475_v36  ;;  %v2890_v38 = vpop.permute.xlu0 %2889  ;;  %v474_v2 = vsub.f32 %v458_v27, %v470_v37 }
 0x300   :  { %v2892_v41 = vunpack.i.h.bf16 %v2890_v38  ;;  %v2891_v43 = vunpack.i.l.bf16 %v2890_v38 }
 0x301   :  { %v481_v5 = vmul.f32 1.442695, %v474_v2 }
 0x302   :  { %v2885_v40 = vpop.permute.xlu1 %2884  ;;  %v2754_v56 = vpack.c.bf16 %v2892_v41, %v2891_v43 }
 0x303   :  { %v2887_v44 = vunpack.i.h.bf16 %v2885_v40  ;;  %v2886_v45 = vunpack.i.l.bf16 %v2885_v40  ;;  %2957 = vpow2.f32 %v481_v5  ;;  %v618_v0 = vpop.permute.xlu0 %617 }
 0x304   :  { %2959 = vpow2.f32 %v479_v6 }
 0x305   :  { %v2954_v48 = vpop.eup %2953  ;;  %v2750_v49 = vpack.c.bf16 %v2887_v44, %v2886_v45 }
 0x306   :  { %v2895_v51 = vpop.permute.xlu1 %2894  ;;  %v486_v54 = vsel %vm176_vm0, %v2954_v48, 0.0 }
 0x307   :  { %v2897_v59 = vunpack.i.h.bf16 %v2895_v51  ;;  %v2896_v60 = vunpack.i.l.bf16 %v2895_v51  ;;  %487 = vadd.xlane.f32.xlu1 %v486_v54  ;;  %2751 = vmatprep.subr.bf16.mxu0 %v2750_v49  ;;  %v2905_v26 = vpop.permute.xlu0 %2904 }
 0x308   :  { %2753 = vmatpush3.bf16.msra.mxu0 %v2750_v49  ;;  %v2907_v27 = vunpack.i.h.bf16 %v2905_v26  ;;  %v2906_v28 = vunpack.i.l.bf16 %v2905_v26 }
 0x309   :  { %v2956_v61 = vpop.eup %2955  ;;  %2755 = vmatprep.subr.bf16.mxu0 %v2754_v56  ;;  %v2758_v1 = vpack.c.bf16 %v2897_v59, %v2896_v60 }
 0x30a   :  { %v483_v63 = vsel %vm176_vm0, %v2956_v61, 0.0  ;;  %v2900_v12 = vpop.permute.xlu1 %2899  ;;  %v2778_v29 = vpack.c.bf16 %v2907_v27, %v2906_v28 }
 0x30b   :  { %484 = vadd.xlane.f32.xlu1 %v483_v63  ;;  %v2902_v20 = vunpack.i.h.bf16 %v2900_v12  ;;  %v2901_v4 = vunpack.i.l.bf16 %v2900_v12  ;;  %v1084_v44 = vpop.permute.xlu0 %1083 }
 0x30c   :  { %2757 = vmatpush3.bf16.msra.mxu0 %v2754_v56 }
 0x30d   :  { %2760 = vmatprep.subr.msk.bf16.mxu0 %vm3323_vm2, %v2758_v1  ;;  %v2958_v7 = vpop.eup %2957  ;;  %v2764_v25 = vpack.c.bf16 %v2902_v20, %v2901_v4 }
 0x30e   :  { %v492_v9 = vsel %vm176_vm0, %v2958_v7, 0.0  ;;  %v2960_v10 = vpop.eup %2959  ;;  %v614_v13 = vpop.permute.xlu1 %613 }
 0x30f   :  { %v489_v11 = vsel %vm176_vm0, %v2960_v10, 0.0 }
 0x31c   :  { %615 = vrot.lane.b32.xlu1 %v3301_v50, %s3113_s23 }
 0x340   :  { %493 = vadd.xlane.f32.xlu1 %v492_v9 }
 0x344   :  { %490 = vadd.xlane.f32.xlu1 %v489_v11 }
 0x355   :  { %619 = vrot.lane.b32.xlu1 %v3311_v55, %s3113_s23 }
 0x359   :  { %2909 = vrot.lane.b32.xlu1 %v3318_v58, %s3114_s24 }
 0x35d   :  { %1085 = vrot.lane.b32.xlu1 %v3301_v50, %s3115_s25 }
 0x361   :  { %1089 = vrot.lane.b32.xlu1 %v3311_v55, %s3115_s25 }
 0x394   :  { %v488_v15 = vpop.xlane.xlu1 %487 }
 0x395   :  { %2961 = vrcp.f32 %v488_v15 }
 0x398   :  { %v485_v16 = vpop.xlane.xlu1 %484 }
 0x399   :  { %2963 = vrcp.f32 %v485_v16 }
 0x39c   :  { %v616_v30 = vpop.permute.xlu1 %615 }
 0x39f   :  { %v2962_v18 = vpop.eup %2961 }
 0x3a0   :  { %v500_v24 = vmul.f32 %v2962_v18, %v2954_v48  ;;  %v1088_v48 = vpop.permute.xlu0 %1087 }
 0x3a3   :  { %v2964_v19 = vpop.eup %2963 }
 0x3a4   :  { %v499_v23 = vmul.f32 %v2964_v19, %v2956_v61 }
 0x3a6   :  { %2572 = vmatprep.mubr.msk.f32.mxu0 %vm176_vm0, %v499_v23 }
 0x3a7   :  { %2573 = vmatmul.mubr.msk.f32.vlgmr.msra.gmra.mrb[0].mxu0 %vm176_vm0, %v500_v24 }
 0x3a8   :  { %2763 = vmatpush3.bf16.xpose.msk.msra.mxu0 %vm3323_vm2, %v2758_v1 }
 0x3a9   :  { %2766 = vmatprep.subr.msk.bf16.mxu0 %vm3323_vm2, %v2764_v25 }
 0x3b0   :  { %2769 = vmatpush3.bf16.xpose.msk.msra.mxu0 %vm3323_vm2, %v2764_v25 }
 0x3b1   :  { %2780 = vmatprep.subr.msk.bf16.mxu0 %vm3323_vm2, %v2778_v29 }
 0x3cd   :  { %v494_v31 = vpop.xlane.xlu1 %493 }
 0x3ce   :  { %2965 = vrcp.f32 %v494_v31 }
 0x3d1   :  { %v491_v32 = vpop.xlane.xlu1 %490 }
 0x3d2   :  { %2967 = vrcp.f32 %v491_v32 }
 0x3d5   :  { %v620_v33 = vpop.permute.xlu1 %619 }
 0x3d8   :  { %v2966_v34 = vpop.eup %2965 }
 0x3d9   :  { %v2910_v36 = vpop.permute.xlu1 %2909  ;;  %v502_v38 = vmul.f32 %v2966_v34, %v2958_v7 }
 0x3da   :  { %v2912_v40 = vunpack.i.h.bf16 %v2910_v36  ;;  %v2911_v41 = vunpack.i.l.bf16 %v2910_v36 }
 0x3dc   :  { %v2968_v35 = vpop.eup %2967  ;;  %v2784_v43 = vpack.c.bf16 %v2912_v40, %v2911_v41 }
 0x3dd   :  { %v501_v37 = vmul.f32 %v2968_v35, %v2960_v10  ;;  %v1086_v45 = vpop.permute.xlu1 %1085 }
 0x3df   :  { %2575 = vmatprep.mubr.msk.f32.mxu0 %vm176_vm0, %v501_v37 }
 0x3e0   :  { %2576 = vmatmul.mubr.msk.f32.gmra.mrb[2].mxu0 %vm176_vm0, %v502_v38 }
 0x3e1   :  { %2586 = vmatprep.mubr.msk.f32.mxu0 %vm353_vm1, %v614_v13  ;;  %v1090_v49 = vpop.permute.xlu1 %1089 }
 0x3e4   :  { %2587 = vmatmul.mubr.msk.f32.vlgmr.msra.gmra.mrb[4].mxu0 %vm353_vm1, %v616_v30 }
 0x3e5   :  { %2783 = vmatpush3.bf16.xpose.msk.msra.mxu0 %vm3323_vm2, %v2778_v29  ;;  %2589 = vmatprep.mubr.msk.f32.mxu0 %vm353_vm1, %v618_v0 }
 0x3e6   :  { %2786 = vmatprep.subr.msk.bf16.mxu0 %vm3323_vm2, %v2784_v43 }
 0x3e8   :  { %2590 = vmatmul.mubr.msk.f32.gmra.mrb[6].mxu0 %vm353_vm1, %v620_v33 }
 0x3e9   :  { %2630 = vmatprep.mubr.msk.f32.mxu0 %vm353_vm1, %v1084_v44 }
 0x3ed   :  { %2789 = vmatpush3.bf16.xpose.msk.msra.mxu0 %vm3323_vm2, %v2784_v43 }
 0x3f4   :  { %2631 = vmatmul.mubr.msk.f32.vlgmr.msra.gmra.mrb[8].mxu0 %vm353_vm1, %v1086_v45 }
 0x3f5   :  { %2633 = vmatprep.mubr.msk.f32.mxu0 %vm353_vm1, %v1088_v48 }
 0x3f8   :  { %2634 = vmatmul.mubr.msk.f32.gmra.mrb[10].mxu0 %vm353_vm1, %v1090_v49 }
 0x47a   :  { %v3430_v51 = vpop.f32.mrb[0].mxu0 }
 0x47b   :  { %v3432_v54 = vpop.f32.mrb[1].mxu0 }
 0x4b3   :  { %v3434_v56 = vpop.f32.mrb[2].mxu0 }
 0x4b4   :  { %v3436_v59 = vpop.f32.mrb[3].mxu0 }
 0x4b7   :  { %v2588_v60 = vpop.f32.mrb[4].mxu0 }
 0x4b8   :  { %v731_v61 = vsel %vm3346_vm3, %v2588_v60, -1e+30  ;;  %v711_v63 = vpop.f32.mrb[5].mxu0 }
 0x4b9   :  { %v730_v1 = vsel %vm3350_vm4, %v711_v63, -1e+30  ;;  %v737_v2 = vsel %vm176_vm0, %v731_v61, -inf }
 0x4ba   :  { %738 = vmax.xlane.f32.xlu1 %v737_v2  ;;  %v734_v3 = vsel %vm176_vm0, %v730_v1, -inf }
 0x4bb   :  { %735 = vmax.xlane.f32.xlu0 %v734_v3  ;;  %v2591_v5 = vpop.f32.mrb[6].mxu0 }
 0x4bc   :  { %v721_v6 = vpop.f32.mrb[7].mxu0  ;;  %v733_v10 = vsel %vm3363_vm6, %v2591_v5, -1e+30 }
 0x4bd   :  { %v732_v7 = vsel %vm3359_vm5, %v721_v6, -1e+30  ;;  %v743_v11 = vsel %vm176_vm0, %v733_v10, -inf }
 0x4be   :  { %v740_v9 = vsel %vm176_vm0, %v732_v7, -inf }
 0x4bf   :  { %741 = vmax.xlane.f32.xlu0 %v740_v9 }
 0x4c3   :  { %744 = vmax.xlane.f32.xlu0 %v743_v11 }
 0x4c7   :  { %v2632_v12 = vpop.f32.mrb[8].mxu0 }
 0x4c8   :  { %v1181_v13 = vpop.f32.mrb[9].mxu0  ;;  %v3479_v41 = vsel %vm3346_vm3, %v2632_v12, -1e+30 }
 0x4c9   :  { %v3473_v38 = vsel %vm3350_vm4, %v1181_v13, -1e+30 }
 0x4ca   :  { %v1204_v40 = vsel %vm176_vm0, %v3473_v38, -inf }
 0x4cb   :  { %v2635_v15 = vpop.f32.mrb[10].mxu0 }
 0x4cc   :  { %v1191_v16 = vpop.f32.mrb[11].mxu0 }
 0x547   :  { %v739_v18 = vpop.xlane.xlu1 %738 }
 0x548   :  { %v747_v0 = vsub.f32 %v731_v61, %v739_v18  ;;  %v736_v19 = vpop.xlane.xlu0 %735 }
 0x549   :  { %v746_v20 = vsub.f32 %v730_v1, %v736_v19 }
 0x54a   :  { %v752_v4 = vmul.f32 1.442695, %v747_v0 }
 0x54b   :  { %v750_v23 = vmul.f32 1.442695, %v746_v20 }
 0x54c   :  { %2969 = vpow2.f32 %v752_v4  ;;  %v742_v24 = vpop.xlane.xlu0 %741 }
 0x54d   :  { %2971 = vpow2.f32 %v750_v23  ;;  %v748_v25 = vsub.f32 %v732_v7, %v742_v24 }
 0x54f   :  { %v754_v26 = vmul.f32 1.442695, %v748_v25 }
 0x550   :  { %v745_v27 = vpop.xlane.xlu0 %744 }
 0x551   :  { %2973 = vpow2.f32 %v754_v26  ;;  %v749_v28 = vsub.f32 %v733_v10, %v745_v27 }
 0x553   :  { %v756_v29 = vmul.f32 1.442695, %v749_v28 }
 0x555   :  { %2975 = vpow2.f32 %v756_v29 }
 0x556   :  { %v3450_v30 = vpop.eup %2969 }
 0x557   :  { %v2972_v31 = vpop.eup %2971  ;;  %v761_v32 = vsel %vm176_vm0, %v3450_v30, 0.0 }
 0x558   :  { %762 = vadd.xlane.f32.xlu0 %v761_v32  ;;  %v758_v33 = vsel %vm176_vm0, %v2972_v31, 0.0 }
 0x559   :  { %759 = vadd.xlane.f32.xlu1 %v758_v33 }
 0x55b   :  { %v3455_v34 = vpop.eup %2973 }
 0x55c   :  { %v764_v35 = vsel %vm176_vm0, %v3455_v34, 0.0 }
 0x55d   :  { %765 = vadd.xlane.f32.xlu1 %v764_v35 }
 0x55f   :  { %v3459_v36 = vpop.eup %2975 }
 0x560   :  { %v767_v37 = vsel %vm176_vm0, %v3459_v36, 0.0 }
 0x561   :  { %768 = vadd.xlane.f32.xlu0 %v767_v37 }
 0x56e   :  { %2914 = vrot.lane.b32.xlu1 %v3309_v53, %s3116_s26 }
 0x572   :  { %2924 = vrot.lane.b32.xlu1 %v3309_v53, %s3117_s27 }
 0x576   :  { %2929 = vrot.lane.b32.xlu1 %v3318_v58, %s3117_s27 }
 0x577   :  { %2919 = vrot.lane.b32.xlu0 %v3318_v58, %s3116_s26 }
 0x57a   :  { %1462 = vrot.lane.b32.xlu1 %v3301_v50, %s3118_s8  ;;  %v3483_v50 = vsel %vm3359_vm5, %v1191_v16, -1e+30 }
 0x57b   :  { %1460 = vrot.lane.b32.xlu0 %v3303_v52, %s3118_s8  ;;  %v1207_v52 = vsel %vm176_vm0, %v3479_v41, -inf }
 0x57e   :  { %1466 = vrot.lane.b32.xlu1 %v3311_v55, %s3118_s8  ;;  %v1210_v55 = vsel %vm176_vm0, %v3483_v50, -inf }
 0x57f   :  { %1464 = vrot.lane.b32.xlu0 %v3314_v57, %s3118_s8  ;;  %v3491_v57 = vsel %vm3363_vm6, %v2635_v15, -1e+30 }
 0x580   :  { %v1213_v43 = vsel %vm176_vm0, %v3491_v57, -inf }
 0x59e   :  { %1205 = vmax.xlane.f32.xlu0 %v1204_v40 }
 0x5a2   :  { %1208 = vmax.xlane.f32.xlu1 %v1207_v52  ;;  %1211 = vmax.xlane.f32.xlu0 %v1210_v55 }
 0x5a6   :  { %1214 = vmax.xlane.f32.xlu0 %v1213_v43 }
 0x5e5   :  { %v763_v45 = vpop.xlane.xlu0 %762 }
 0x5e6   :  { %v760_v44 = vpop.xlane.xlu1 %759 }
 0x5e7   :  { %2977 = vrcp.f32 %v760_v44 }
 0x5e8   :  { %2979 = vrcp.f32 %v763_v45 }
 0x5ea   :  { %v766_v48 = vpop.xlane.xlu1 %765 }
 0x5eb   :  { %2981 = vrcp.f32 %v766_v48 }
 0x5ee   :  { %v2915_v49 = vpop.permute.xlu1 %2914  ;;  %v769_v60 = vpop.xlane.xlu0 %768 }
 0x5ef   :  { %v2917_v61 = vunpack.i.h.bf16 %v2915_v49  ;;  %v2916_v63 = vunpack.i.l.bf16 %v2915_v49  ;;  %2983 = vrcp.f32 %v769_v60  ;;  %v2368_v49 = vld [vmem:[%s3709_s3 + $0x8] sm:$0xff]  ;;  %v612_v60 = vld [vmem:[%s3709_s3] sm:$0xff] }
 0x5f1   :  { %v2978_v1 = vpop.eup %2977  ;;  %v2770_v2 = vpack.c.bf16 %v2917_v61, %v2916_v63 }
 0x5f2   :  { %v2925_v3 = vpop.permute.xlu1 %2924  ;;  %v2920_v5 = vpop.permute.xlu0 %2919  ;;  %v774_v6 = vmul.f32 %v2978_v1, %v2972_v31 }
 0x5f3   :  { %v2927_v7 = vunpack.i.h.bf16 %v2925_v3  ;;  %v2926_v9 = vunpack.i.l.bf16 %v2925_v3  ;;  %v2922_v10 = vunpack.i.h.bf16 %v2920_v5  ;;  %v2921_v11 = vunpack.i.l.bf16 %v2920_v5  ;;  %2771 = vmatprep.subr.bf16.mxu1 %v2770_v2  ;;  %v2980_v15 = vpop.eup %2979 }
 0x5f4   :  { %2773 = vmatpush3.bf16.msra.mxu1 %v2770_v2  ;;  %2600 = vmatprep.mubr.msk.f32.mxu1 %vm176_vm0, %v774_v6  ;;  %v775_v4 = vmul.f32 %v2980_v15, %v3450_v30 }
 0x5f5   :  { %v2798_v12 = vpack.c.bf16 %v2927_v7, %v2926_v9  ;;  %v2774_v13 = vpack.c.bf16 %v2922_v10, %v2921_v11  ;;  %v2982_v0 = vpop.eup %2981 }
 0x5f6   :  { %v2930_v16 = vpop.permute.xlu1 %2929  ;;  %v1461_v18 = vpop.permute.xlu0 %1460  ;;  %v776_v25 = vmul.f32 %v2982_v0, %v3455_v34 }
 0x5f7   :  { %v2932_v19 = vunpack.i.h.bf16 %v2930_v16  ;;  %v2931_v20 = vunpack.i.l.bf16 %v2930_v16  ;;  %2775 = vmatprep.subr.bf16.mxu1 %v2774_v13  ;;  %2800 = vmatprep.subr.msk.bf16.mxu0 %vm3323_vm2, %v2798_v12 }
 0x5f8   :  { %2666 = vmatprep.mubr.msk.f32.mxu0 %vm353_vm1, %v1461_v18  ;;  %2777 = vmatpush3.bf16.msra.mxu1 %v2774_v13 }
 0x5f9   :  { %v2804_v23 = vpack.c.bf16 %v2932_v19, %v2931_v20  ;;  %2803 = vmatpush3.bf16.xpose.msk.msra.mxu0 %vm3323_vm2, %v2798_v12  ;;  %v2984_v24 = vpop.eup %2983  ;;  %2606 = vmatprep.subr.mxu1 %v2368_v49 }
 0x5fa   :  { %v777_v26 = vmul.f32 %v2984_v24, %v3459_v36  ;;  %v1463_v27 = vpop.permute.xlu1 %1462  ;;  %v1465_v28 = vpop.permute.xlu0 %1464 }
 0x5fb   :  { %2601 = vmatmul.mubr.msk.f32.vlgmr.msra.gmra.mrb[8].mxu1 %vm176_vm0, %v775_v4  ;;  %2806 = vmatprep.subr.msk.bf16.mxu0 %vm3323_vm2, %v2804_v23 }
 0x5fc   :  { %2603 = vmatprep.mubr.msk.f32.mxu1 %vm176_vm0, %v776_v25  ;;  %2607 = vmatpush3.msra.mxu1 %v2368_v49 }
 0x5fd   :  { %2614 = vmatprep.subr.mxu1 %v612_v60 }
 0x5fe   :  { %v1467_v29 = vpop.permute.xlu1 %1466 }
 0x5ff   :  { %2604 = vmatmul.mubr.msk.f32.gmra.mrb[10].mxu1 %vm176_vm0, %v777_v26 }
 0x601   :  { %2809 = vmatpush3.bf16.xpose.msk.msra.mxu0 %vm3323_vm2, %v2804_v23 }
 0x608   :  { %2667 = vmatmul.mubr.msk.f32.vlgmr.msra.gmra.mrb[12].mxu0 %vm353_vm1, %v1463_v27 }
 0x609   :  { %2669 = vmatprep.mubr.msk.f32.mxu0 %vm353_vm1, %v1465_v28 }
 0x60c   :  { %2670 = vmatmul.mubr.msk.f32.gmra.mrb[14].mxu0 %vm353_vm1, %v1467_v29 }
 0x62b   :  { %v1206_v30 = vpop.xlane.xlu0 %1205 }
 0x62c   :  { %v1216_v31 = vsub.f32 %v3473_v38, %v1206_v30 }
 0x62e   :  { %v1220_v32 = vmul.f32 1.442695, %v1216_v31 }
 0x62f   :  { %v1209_v33 = vpop.xlane.xlu1 %1208  ;;  %v1212_v34 = vpop.xlane.xlu0 %1211 }
 0x630   :  { %2985 = vpow2.f32 %v1220_v32  ;;  %v1217_v35 = vsub.f32 %v3479_v41, %v1209_v33  ;;  %v1218_v62 = vsub.f32 %v3483_v50, %v1212_v34 }
 0x632   :  { %v1222_v36 = vmul.f32 1.442695, %v1217_v35  ;;  %v1224_v37 = vmul.f32 1.442695, %v1218_v62 }
 0x633   :  { %v1215_v40 = vpop.xlane.xlu0 %1214 }
 0x634   :  { %2987 = vpow2.f32 %v1222_v36  ;;  %v1219_v52 = vsub.f32 %v3491_v57, %v1215_v40 }
 0x635   :  { %2989 = vpow2.f32 %v1224_v37 }
 0x636   :  { %v1226_v55 = vmul.f32 1.442695, %v1219_v52 }
 0x638   :  { %2991 = vpow2.f32 %v1226_v55 }
 0x63a   :  { %v2986_v43 = vpop.eup %2985 }
 0x63b   :  { %v1228_v38 = vsel %vm176_vm0, %v2986_v43, 0.0 }
 0x63c   :  { %1229 = vadd.xlane.f32.xlu1 %v1228_v38 }
 0x63e   :  { %v2988_v44 = vpop.eup %2987 }
 0x63f   :  { %v3519_v45 = vpop.eup %2989  ;;  %v1231_v41 = vsel %vm176_vm0, %v2988_v44, 0.0 }
 0x640   :  { %1232 = vadd.xlane.f32.xlu0 %v1231_v41  ;;  %v1234_v50 = vsel %vm176_vm0, %v3519_v45, 0.0 }
 0x641   :  { %1235 = vadd.xlane.f32.xlu1 %v1234_v50 }
 0x642   :  { %v3524_v48 = vpop.eup %2991 }
 0x643   :  { %v1237_v57 = vsel %vm176_vm0, %v3524_v48, 0.0 }
 0x644   :  { %1238 = vadd.xlane.f32.xlu0 %v1237_v57 }
 0x652   :  { %2934 = vrot.lane.b32.xlu1 %v3309_v53, %s3119_s30 }
 0x65a   :  { %2939 = vrot.lane.b32.xlu0 %v3318_v58, %s3119_s30 }
 0x6c9   :  { %v1230_v61 = vpop.xlane.xlu1 %1229 }
 0x6ca   :  { %2993 = vrcp.f32 %v1230_v61 }
 0x6cd   :  { %v1233_v63 = vpop.xlane.xlu0 %1232 }
 0x6ce   :  { %v1236_v1 = vpop.xlane.xlu1 %1235  ;;  %v2602_v2 = vpop.f32.mrb[8].mxu1  ;;  %2995 = vrcp.f32 %v1233_v63 }
 0x6cf   :  { %v868_v3 = vpop.f32.mrb[9].mxu1  ;;  %2997 = vrcp.f32 %v1236_v1 }
 0x6d0   :  { %2608 = vmatprep.mubr.msk.f32.mxu1 %vm353_vm1, %v868_v3 }
 0x6d1   :  { %v1239_v5 = vpop.xlane.xlu0 %1238  ;;  %2609 = vmatmul.mubr.msk.f32.vlgmr.msra.gmra.mrb[12].mxu1 %vm353_vm1, %v2602_v2 }
 0x6d2   :  { %v2935_v6 = vpop.permute.xlu1 %2934  ;;  %v2605_v7 = vpop.f32.mrb[10].mxu1  ;;  %2615 = vmatpush3.msra.mxu1 %v612_v60  ;;  %2999 = vrcp.f32 %v1239_v5 }
 0x6d3   :  { %v2937_v9 = vunpack.i.h.bf16 %v2935_v6  ;;  %v2936_v10 = vunpack.i.l.bf16 %v2935_v6  ;;  %v878_v11 = vpop.f32.mrb[11].mxu1 }
 0x6d4   :  { %2611 = vmatprep.mubr.msk.f32.mxu1 %vm353_vm1, %v878_v11  ;;  %v2994_v0 = vpop.eup %2993 }
 0x6d5   :  { %v2790_v12 = vpack.c.bf16 %v2937_v9, %v2936_v10  ;;  %v2940_v13 = vpop.permute.xlu0 %2939  ;;  %2612 = vmatmul.mubr.msk.f32.gmra.mrb[14].mxu1 %vm353_vm1, %v2605_v7 }
 0x6d6   :  { %v2942_v15 = vunpack.i.h.bf16 %v2940_v13  ;;  %v2941_v16 = vunpack.i.l.bf16 %v2940_v13  ;;  %2616 = vmatprep.mubr.msk.f32.mxu1 %vm353_vm1, %v3432_v54 }
 0x6d7   :  { %2791 = vmatprep.subr.bf16.mxu1 %v2790_v12 }
 0x6d8   :  { %v2794_v18 = vpack.c.bf16 %v2942_v15, %v2941_v16  ;;  %v2996_v20 = vpop.eup %2995 }
 0x6d9   :  { %2617 = vmatmul.mubr.msk.f32.vlgmr.msra.gmra.mrb[12].mxu1 %vm353_vm1, %v3430_v51  ;;  %v2998_v24 = vpop.eup %2997  ;;  %v1244_v51 = vmul.f32 %v2994_v0, %v2986_v43  ;;  %v1245_v26 = vmul.f32 %v2996_v20, %v2988_v44 }
 0x6da   :  { %2793 = vmatpush3.bf16.msra.mxu1 %v2790_v12  ;;  %2619 = vmatprep.mubr.msk.f32.mxu1 %vm353_vm1, %v3436_v59  ;;  %v1246_v29 = vmul.f32 %v2998_v24, %v3519_v45 }
 0x6db   :  { %2795 = vmatprep.subr.bf16.mxu1 %v2794_v18  ;;  %v2668_v19 = vpop.f32.mrb[12].mxu0 }
 0x6dc   :  { %v1578_v4 = vsel %vm3346_vm3, %v2668_v19, -1e+30  ;;  %v1558_v23 = vpop.f32.mrb[13].mxu0  ;;  %v3000_v14 = vpop.eup %2999  ;;  %v2406_v19 = vld [vmem:[%s3709_s3 + $0x18] sm:$0xff] }
 0x6dd   :  { %v1577_v54 = vsel %vm3350_vm4, %v1558_v23, -1e+30  ;;  %v1584_v25 = vsel %vm176_vm0, %v1578_v4, -inf  ;;  %2620 = vmatmul.mubr.msk.f32.gmra.mrb[14].mxu1 %vm353_vm1, %v3434_v56  ;;  %v1247_v32 = vmul.f32 %v3000_v14, %v3524_v48 }
 0x6de   :  { %1585 = vmax.xlane.f32.xlu0 %v1584_v25  ;;  %2797 = vmatpush3.bf16.msra.mxu1 %v2794_v18  ;;  %v1581_v59 = vsel %vm176_vm0, %v1577_v54, -inf }
 0x6df   :  { %v2671_v27 = vpop.f32.mrb[14].mxu0  ;;  %1582 = vmax.xlane.f32.xlu1 %v1581_v59  ;;  %2644 = vmatprep.mubr.msk.f32.mxu1 %vm176_vm0, %v1244_v51 }
 0x6e0   :  { %v1580_v17 = vsel %vm3363_vm6, %v2671_v27, -1e+30  ;;  %v1568_v28 = vpop.f32.mrb[15].mxu0  ;;  %2650 = vmatprep.subr.mxu1 %v2389_v22  ;;  %v2411_v27 = vld [vmem:[%s3710_s4] ss:$0 sm:$0xff] }
 0x6e1   :  { %v1579_v56 = vsel %vm3359_vm5, %v1568_v28, -1e+30  ;;  %v1590_v30 = vsel %vm176_vm0, %v1580_v17, -inf  ;;  %2645 = vmatmul.mubr.msk.f32.vlgmr.msra.gmra.mrb[16].mxu1 %vm176_vm0, %v1245_v26 }
 0x6e2   :  { %1591 = vmax.xlane.f32.xlu0 %v1590_v30  ;;  %v1587_v31 = vsel %vm176_vm0, %v1579_v56, -inf  ;;  %2647 = vmatprep.mubr.msk.f32.mxu1 %vm176_vm0, %v1246_v29 }
 0x6e3   :  { %1588 = vmax.xlane.f32.xlu1 %v1587_v31  ;;  %2651 = vmatpush3.msra.mxu1 %v2389_v22 }
 0x6e5   :  { %2648 = vmatmul.mubr.msk.f32.gmra.mrb[18].mxu1 %vm176_vm0, %v1247_v32 }
 0x76b   :  { %v1586_v21 = vpop.xlane.xlu0 %1585 }
 0x76c   :  { %v1594_v33 = vsub.f32 %v1578_v4, %v1586_v21  ;;  %v1583_v34 = vpop.xlane.xlu1 %1582 }
 0x76d   :  { %v1593_v35 = vsub.f32 %v1577_v54, %v1583_v34 }
 0x76e   :  { %v1599_v62 = vmul.f32 1.442695, %v1594_v33 }
 0x76f   :  { %v1597_v36 = vmul.f32 1.442695, %v1593_v35  ;;  %v1592_v37 = vpop.xlane.xlu0 %1591 }
 0x770   :  { %3001 = vpow2.f32 %v1599_v62  ;;  %v1596_v40 = vsub.f32 %v1580_v17, %v1592_v37  ;;  %v1589_v52 = vpop.xlane.xlu1 %1588 }
 0x771   :  { %3003 = vpow2.f32 %v1597_v36  ;;  %v1595_v55 = vsub.f32 %v1579_v56, %v1589_v52 }
 0x772   :  { %v1603_v43 = vmul.f32 1.442695, %v1596_v40 }
 0x773   :  { %v1601_v38 = vmul.f32 1.442695, %v1595_v55 }
 0x774   :  { %3005 = vpow2.f32 %v1603_v43 }
 0x775   :  { %3007 = vpow2.f32 %v1601_v38 }
 0x77a   :  { %v3002_v44 = vpop.eup %3001 }
 0x77b   :  { %v3004_v45 = vpop.eup %3003  ;;  %v1608_v41 = vsel %vm176_vm0, %v3002_v44, 0.0 }
 0x77c   :  { %1609 = vadd.xlane.f32.xlu0 %v1608_v41  ;;  %v1605_v50 = vsel %vm176_vm0, %v3004_v45, 0.0 }
 0x77d   :  { %1606 = vadd.xlane.f32.xlu1 %v1605_v50 }
 0x77e   :  { %v3006_v48 = vpop.eup %3005 }
 0x77f   :  { %v3008_v57 = vpop.eup %3007  ;;  %v1614_v49 = vsel %vm176_vm0, %v3006_v48, 0.0 }
 0x780   :  { %1615 = vadd.xlane.f32.xlu0 %v1614_v49  ;;  %v1611_v60 = vsel %vm176_vm0, %v3008_v57, 0.0 }
 0x781   :  { %1612 = vadd.xlane.f32.xlu1 %v1611_v60 }
 0x792   :  { %2944 = vrot.lane.b32.xlu1 %v3309_v53, %s3120_s16 }
 0x796   :  { %2949 = vrot.lane.b32.xlu0 %v3318_v58, %s3120_s16 }
 0x7b4   :  { %v2646_v61 = vpop.f32.mrb[16].mxu1 }
 0x7b5   :  { %v1338_v63 = vpop.f32.mrb[17].mxu1 }
 0x7b6   :  { %2652 = vmatprep.mubr.msk.f32.mxu1 %vm353_vm1, %v1338_v63 }
 0x7b7   :  { %2653 = vmatmul.mubr.msk.f32.vlgmr.msra.gmra.mrb[12].mxu1 %vm353_vm1, %v2646_v61 }
 0x7b8   :  { %v2649_v1 = vpop.f32.mrb[18].mxu1 }
 0x7b9   :  { %v1348_v2 = vpop.f32.mrb[19].mxu1 }
 0x7ba   :  { %2655 = vmatprep.mubr.msk.f32.mxu1 %vm353_vm1, %v1348_v2  ;;  %v1931_v2 = vld [vmem:[#allocation2] sm:$0xff] }
 0x7bb   :  { %2656 = vmatmul.mubr.msk.f32.gmra.mrb[14].mxu1 %vm353_vm1, %v2649_v1 }
 0x809   :  { %v1610_v3 = vpop.xlane.xlu0 %1609 }
 0x80a   :  { %v1607_v5 = vpop.xlane.xlu1 %1606 }
 0x80b   :  { %3009 = vrcp.f32 %v1607_v5 }
 0x80c   :  { %3011 = vrcp.f32 %v1610_v3  ;;  %v1932_v3 = vld [vmem:[#allocation2 + $0x8] sm:$0xff] }
 0x80d   :  { %v1616_v6 = vpop.xlane.xlu0 %1615  ;;  %v2818_v5 = vpack.c.bf16 %v1932_v3, %v1931_v2 }
 0x80e   :  { %v1613_v7 = vpop.xlane.xlu1 %1612 }
 0x80f   :  { %3013 = vrcp.f32 %v1613_v7  ;;  %2819 = vmatprep.subr.bf16.mxu0 %v2818_v5  ;;  %v1934_v7 = vld [vmem:[#allocation2 + $0x18] sm:$0xff] }
 0x810   :  { %3015 = vrcp.f32 %v1616_v6  ;;  %2821 = vmatpush3.bf16.msra.mxu0 %v2818_v5  ;;  %v1933_v6 = vld [vmem:[#allocation2 + $0x10] sm:$0xff] }
 0x811   :  { %v2950_v53 = vpop.permute.xlu0 %2949 }
 0x812   :  { %v2945_v58 = vpop.permute.xlu1 %2944  ;;  %v2952_v9 = vunpack.i.h.bf16 %v2950_v53  ;;  %v2951_v10 = vunpack.i.l.bf16 %v2950_v53  ;;  %v2822_v53 = vpack.c.bf16 %v1934_v7, %v1933_v6 }
 0x813   :  { %v2947_v11 = vunpack.i.h.bf16 %v2945_v58  ;;  %v2946_v12 = vunpack.i.l.bf16 %v2945_v58  ;;  %v2043_v58 = vld [vmem:[%s3715_s9] sm:$0xff] }
 0x814   :  { %v2814_v18 = vpack.c.bf16 %v2952_v9, %v2951_v10  ;;  %2823 = vmatprep.subr.bf16.mxu0 %v2822_v53  ;;  %v2044_v9 = vld [vmem:[%s3715_s9 + $0x8] sm:$0xff] }
 0x815   :  { %v3010_v13 = vpop.eup %3009  ;;  %v2810_v15 = vpack.c.bf16 %v2947_v11, %v2946_v12  ;;  %2825 = vmatpush3.bf16.msra.mxu0 %v2822_v53  ;;  %v2826_v10 = vpack.c.bf16 %v2044_v9, %v2043_v58 }
 0x816   :  { %v1621_v16 = vmul.f32 %v3010_v13, %v3004_v45  ;;  %v3012_v0 = vpop.eup %3011 }
 0x817   :  { %2811 = vmatprep.subr.bf16.mxu1 %v2810_v15  ;;  %v1622_v4 = vmul.f32 %v3012_v0, %v3002_v44  ;;  %2827 = vmatprep.subr.bf16.mxu0 %v2826_v10 }
 0x818   :  { %2813 = vmatpush3.bf16.msra.mxu1 %v2810_v15  ;;  %2680 = vmatprep.mubr.msk.f32.mxu1 %vm176_vm0, %v1621_v16 }
 0x819   :  { %2815 = vmatprep.subr.bf16.mxu1 %v2814_v18  ;;  %v3014_v20 = vpop.eup %3013 }
 0x81a   :  { %v3016_v23 = vpop.eup %3015  ;;  %v1623_v24 = vmul.f32 %v3014_v20, %v3008_v57 }
 0x81b   :  { %v1624_v54 = vmul.f32 %v3016_v23, %v3006_v48 }
 0x81c   :  { %2817 = vmatpush3.bf16.msra.mxu1 %v2814_v18 }
 0x81d   :  { %2686 = vmatprep.subr.mxu1 %v2406_v19 }
 0x81f   :  { %2681 = vmatmul.mubr.msk.f32.vlgmr.msra.gmra.mrb[20].mxu1 %vm176_vm0, %v1622_v4 }
 0x820   :  { %2683 = vmatprep.mubr.msk.f32.mxu1 %vm176_vm0, %v1623_v24  ;;  %2687 = vmatpush3.msra.mxu1 %v2406_v19 }
 0x823   :  { %2684 = vmatmul.mubr.msk.f32.gmra.mrb[22].mxu1 %vm176_vm0, %v1624_v54 }
 0x8f2   :  { %v2682_v25 = vpop.f32.mrb[20].mxu1 }
 0x8f3   :  { %v1715_v51 = vpop.f32.mrb[21].mxu1 }
 0x8f4   :  { %2688 = vmatprep.mubr.msk.f32.mxu1 %vm353_vm1, %v1715_v51 }
 0x8f5   :  { %2689 = vmatmul.mubr.msk.f32.vlgmr.msra.gmra.mrb[12].mxu1 %vm353_vm1, %v2682_v25  ;;  %v3614_v25 = vld [vmem:[%s3711_s5] ss:$0 sm:$0xff] }
 0x8f6   :  { %v2685_v59 = vpop.f32.mrb[22].mxu1 }
 0x8f7   :  { %v1725_v26 = vpop.f32.mrb[23].mxu1 }
 0x8f8   :  { %2691 = vmatprep.mubr.msk.f32.mxu1 %vm353_vm1, %v1725_v26 }
 0x8f9   :  { %2692 = vmatmul.mubr.msk.f32.gmra.mrb[14].mxu1 %vm353_vm1, %v2685_v59 }
 0x9c8   :  { %v2690_v14 = vpop.f32.mrb[12].mxu1 }
 0x9c9   :  { %v1845_v17 = vadd.f32 %v2690_v14, %v2411_v27  ;;  %v1814_v28 = vpop.f32.mrb[13].mxu1 }
 0x9ca   :  { %v1844_v29 = vadd.f32 %v2411_v27, %v1814_v28 }
 0x9cb   :  { %v1853_v56 = vadd.f32 %v1845_v17, %v3281_v42 }
 0x9cc   :  { %v2693_v30 = vpop.f32.mrb[14].mxu1  ;;  %v1852_v31 = vadd.f32 %v1844_v29, %v3278_v39  ;;  %v2045_v29 = vld [vmem:[%s3715_s9 + $0x10] sm:$0xff] }
 0x9cd   :  { %v1847_v32 = vadd.f32 %v2693_v30, %v2411_v27  ;;  %v1824_v22 = vpop.f32.mrb[15].mxu1  ;;  %v1859_v21 = vsel %vm176_vm0, %v1853_v56, 0.0 }
 0x9ce   :  { %v1846_v33 = vadd.f32 %v2411_v27, %v1824_v22  ;;  %1860 = vadd.xlane.f32.xlu0 %v1859_v21  ;;  %v1856_v34 = vsel %vm176_vm0, %v1852_v31, 0.0  ;;  %v3619_v27 = vld [vmem:[%s3712_s6] ss:$0 sm:$0xff] }
 0x9cf   :  { %1857 = vadd.xlane.f32.xlu1 %v1856_v34  ;;  %v1855_v35 = vadd.f32 %v1847_v32, %v3292_v47 }
 0x9d0   :  { %v1854_v62 = vadd.f32 %v1846_v33, %v3288_v46 }
 0x9d1   :  { %v1865_v36 = vsel %vm176_vm0, %v1855_v35, 0.0 }
 0x9d2   :  { %1866 = vadd.xlane.f32.xlu0 %v1865_v36  ;;  %v1862_v42 = vsel %vm176_vm0, %v1854_v62, 0.0  ;;  %v2048_v36 = vld [vmem:[%s3715_s9 + $0x28] sm:$0xff] }
 0x9d3   :  { %1863 = vadd.xlane.f32.xlu1 %v1862_v42 }
 0xa5b   :  { %v1861_v39 = vpop.xlane.xlu0 %1860 }
 0xa5c   :  { %v1870_v37 = vmul.f32 0.03125, %v1861_v39  ;;  %v1858_v40 = vpop.xlane.xlu1 %1857 }
 0xa5d   :  { %v1869_v52 = vmul.f32 0.03125, %v1858_v40  ;;  %v2049_v40 = vld [vmem:[%s3715_s9 + $0x30] sm:$0xff] }
 0xa5e   :  { %v1874_v55 = vsub.f32 %v1853_v56, %v1870_v37  ;;  %v2046_v56 = vld [vmem:[%s3715_s9 + $0x18] sm:$0xff] }
 0xa5f   :  { %v1873_v43 = vsub.f32 %v1852_v31, %v1869_v52  ;;  %v1867_v38 = vpop.xlane.xlu0 %1866  ;;  %v2830_v34 = vpack.c.bf16 %v2046_v56, %v2045_v29  ;;  %v2050_v52 = vld [vmem:[%s3715_s9 + $0x38] sm:$0xff] }
 0xa60   :  { %v1872_v44 = vmul.f32 0.03125, %v1867_v38  ;;  %v1864_v45 = vpop.xlane.xlu1 %1863  ;;  %v1878_v41 = vmul.f32 %v1874_v55, %v1874_v55 }
 0xa61   :  { %v1871_v50 = vmul.f32 0.03125, %v1864_v45  ;;  %v1877_v47 = vmul.f32 %v1873_v43, %v1873_v43 }
 0xa62   :  { %v1876_v48 = vsub.f32 %v1855_v35, %v1872_v44  ;;  %v1884_v46 = vsel %vm176_vm0, %v1878_v41, 0.0 }
 0xa63   :  { %v1875_v57 = vsub.f32 %v1854_v62, %v1871_v50  ;;  %1885 = vadd.xlane.f32.xlu0 %v1884_v46  ;;  %v1881_v49 = vsel %vm176_vm0, %v1877_v47, 0.0  ;;  %v2047_v62 = vld [vmem:[%s3715_s9 + $0x20] sm:$0xff] }
 0xa64   :  { %1882 = vadd.xlane.f32.xlu1 %v1881_v49  ;;  %v1880_v60 = vmul.f32 %v1876_v48, %v1876_v48  ;;  %v2834_v37 = vpack.c.bf16 %v2048_v36, %v2047_v62 }
 0xa65   :  { %v1879_v61 = vmul.f32 %v1875_v57, %v1875_v57 }
 0xa66   :  { %v1890_v63 = vsel %vm176_vm0, %v1880_v60, 0.0 }
 0xa67   :  { %1891 = vadd.xlane.f32.xlu0 %v1890_v63  ;;  %v1887_v1 = vsel %vm176_vm0, %v1879_v61, 0.0  ;;  %v2419_v63 = vld [vmem:[%s3716_s10] ss:$0 sm:$0xff]  ;;  %s3121_s10 = smov [#allocation7]  }
 0xa68   :  { %1888 = vadd.xlane.f32.xlu1 %v1887_v1  ;;  %s2326_s14 = sshll.u32 %s3121_s10, 4  ;;  %s2327_s14 = int_to_ptr.vmem [resolvable:$true] %s2326_s14 }
 0xa69   :  { %s3077_s15 = scalar_lea.vmem %s2327_s14, 512  ;;  %p3082_p3 = scmp.lt.s32.totalorder %s2327_s14, %s2327_s14 }
 0xa6a   :  { %p3078_p2 = scmp.ne.s32.totalorder %s2327_s14, %s3077_s15  ;;  %p3083_p4 = scmp.lt.s32.totalorder %s3077_s15, %s3077_s15 }
 0xa6c   :  { %p3084_p5 = por %p3083_p4, %p3082_p3 }
 0xa6e   :  { %p3085_p6 = pnand %p3084_p5, %p3078_p2 }
 0xaf0   :  { %v1886_v11 = vpop.xlane.xlu0 %1885 }
 0xaf1   :  { %v1894_v12 = vmul.f32 0.03125, %v1886_v11  ;;  %v1883_v13 = vpop.xlane.xlu1 %1882 }
 0xaf2   :  { %v1893_v15 = vmul.f32 0.03125, %v1883_v13 }
 0xaf3   :  { %v1898_v16 = vadd.f32 1e-05, %v1894_v12 }
 0xaf4   :  { %v1897_v18 = vadd.f32 1e-05, %v1893_v15  ;;  %v1892_v0 = vpop.xlane.xlu0 %1891 }
 0xaf5   :  { %3017 = vrsqrt.f32 %v1898_v16  ;;  %v1896_v19 = vmul.f32 0.03125, %v1892_v0  ;;  %v1889_v20 = vpop.xlane.xlu1 %1888 }
 0xaf6   :  { %3019 = vrsqrt.f32 %v1897_v18  ;;  %v1895_v4 = vmul.f32 0.03125, %v1889_v20 }
 0xaf7   :  { %v1900_v23 = vadd.f32 1e-05, %v1896_v19 }
 0xaf8   :  { %v1899_v24 = vadd.f32 1e-05, %v1895_v4 }
 0xaf9   :  { %3021 = vrsqrt.f32 %v1900_v23 }
 0xafa   :  { %3023 = vrsqrt.f32 %v1899_v24 }
 0xaff   :  { %v3018_v54 = vpop.eup %3017 }
 0xb00   :  { %v3020_v51 = vpop.eup %3019  ;;  %v1906_v59 = vmul.f32 %v3018_v54, %v1874_v55  ;;  %v2838_v55 = vpack.c.bf16 %v2050_v52, %v2049_v40 }
 0xb01   :  { %v1905_v26 = vmul.f32 %v3020_v51, %v1873_v43  ;;  %v2414_v43 = vld [vmem:[#allocation5] ss:$0 sm:$0xff] }
 0xb02   :  { %v1917_v14 = vmul.f32 %v3614_v25, %v1906_v59 }
 0xb03   :  { %v3022_v17 = vpop.eup %3021  ;;  %v1916_v28 = vmul.f32 %v3614_v25, %v1905_v26 }
 0xb04   :  { %v3024_v30 = vpop.eup %3023  ;;  %v1908_v31 = vmul.f32 %v3022_v17, %v1876_v48  ;;  %v1928_v21 = vadd.f32 %v3619_v27, %v1917_v14 }
 0xb05   :  { %v1927_v32 = vadd.f32 %v3619_v27, %v1916_v28  ;;  %v1907_v22 = vmul.f32 %v3024_v30, %v1875_v57 }
 0xb06   :  { %v1919_v33 = vmul.f32 %v3614_v25, %v1908_v31 }
 0xb07   :  { %2702 = vmatprep.mubr.msk.f32.mxu0 %vm176_vm0, %v1927_v32  ;;  %v1918_v35 = vmul.f32 %v3614_v25, %v1907_v22 }
 0xb08   :  { %2703 = vmatmul.mubr.msk.f32.vlgmr.msra.gmra.mrb[16].mxu0 %vm176_vm0, %v1928_v21  ;;  %v1930_v39 = vadd.f32 %v3619_v27, %v1919_v33 }
 0xb09   :  { %v1929_v42 = vadd.f32 %v3619_v27, %v1918_v35  ;;  %2829 = vmatpush3.bf16.msra.mxu0 %v2826_v10 }
 0xb0a   :  { %2831 = vmatprep.subr.bf16.mxu0 %v2830_v34 }
 0xb0b   :  { %2705 = vmatprep.mubr.msk.f32.mxu0 %vm176_vm0, %v1929_v42 }
 0xb0c   :  { %2706 = vmatmul.mubr.msk.f32.gmra.mrb[18].mxu0 %vm176_vm0, %v1930_v39 }
 0xb0d   :  { %2833 = vmatpush3.bf16.msra.mxu0 %v2830_v34 }
 0xb0e   :  { %2835 = vmatprep.subr.bf16.mxu0 %v2834_v37 }
 0xb11   :  { %2837 = vmatpush3.bf16.msra.mxu0 %v2834_v37 }
 0xb12   :  { %2839 = vmatprep.subr.bf16.mxu0 %v2838_v55 }
 0xb15   :  { %2841 = vmatpush3.bf16.msra.mxu0 %v2838_v55 }
 0xbdb   :  { %v2704_v38 = vpop.f32.mrb[16].mxu0 }
 0xbdc   :  { %v2026_v44 = vadd.f32 %v2704_v38, %v2414_v43  ;;  %v2020_v45 = vpop.f32.mrb[17].mxu0 }
 0xbdd   :  { %v2021_v41 = vadd.f32 %v2414_v43, %v2020_v45 }
 0xbde   :  { %v2040_v48 = vmax.f32 %v2026_v44, 0.0 }
 0xbdf   :  { %v2039_v50 = vmax.f32 %v2021_v41, 0.0  ;;  %v2707_v47 = vpop.f32.mrb[18].mxu0 }
 0xbe0   :  { %v2036_v46 = vadd.f32 %v2707_v47, %v2414_v43  ;;  %v2030_v57 = vpop.f32.mrb[19].mxu0 }
 0xbe1   :  { %v2031_v49 = vadd.f32 %v2414_v43, %v2030_v57  ;;  %2724 = vmatprep.mubr.msk.f32.mxu0 %vm2058_vm7, %v2039_v50 }
 0xbe2   :  { %2725 = vmatmul.mubr.msk.f32.vlgmr.msra.gmra.mrb[20].mxu0 %vm2058_vm7, %v2040_v48  ;;  %v2042_v61 = vmax.f32 %v2036_v46, 0.0 }
 0xbe3   :  { %v2041_v60 = vmax.f32 %v2031_v49, 0.0 }
 0xbe5   :  { %2727 = vmatprep.mubr.msk.f32.mxu0 %vm2058_vm7, %v2041_v60 }
 0xbe6   :  { %2728 = vmatmul.mubr.msk.f32.gmra.mrb[22].mxu0 %vm2058_vm7, %v2042_v61 }
 0xcb5   :  { %v2726_v1 = vpop.f32.mrb[20].mxu0 }
 0xcb6   :  { %v2143_v2 = vadd.f32 %v2726_v1, %v2419_v63  ;;  %v2137_v3 = vpop.f32.mrb[21].mxu0 }
 0xcb7   :  { %v2138_v5 = vadd.f32 %v2419_v63, %v2137_v3 }
 0xcb8   :  { %v2159_v6 = vsel %vm176_vm0, %v2143_v2, 0.0 }
 0xcb9   :  { %2160 = vadd.xlane.f32.xlu0 %v2159_v6  ;;  %v2729_v7 = vpop.f32.mrb[22].mxu0  ;;  %v2156_v53 = vsel %vm176_vm0, %v2138_v5, 0.0 }
 0xcba   :  { %v2153_v58 = vadd.f32 %v2729_v7, %v2419_v63  ;;  %2157 = vadd.xlane.f32.xlu1 %v2156_v53  ;;  %v2147_v9 = vpop.f32.mrb[23].mxu0 }
 0xcbb   :  { %v2148_v10 = vadd.f32 %v2419_v63, %v2147_v9 }
 0xcbc   :  { %v2165_v11 = vsel %vm176_vm0, %v2153_v58, 0.0 }
 0xcbd   :  { %2166 = vadd.xlane.f32.xlu0 %v2165_v11  ;;  %v2162_v12 = vsel %vm176_vm0, %v2148_v10, 0.0 }
 0xcbe   :  { %2163 = vadd.xlane.f32.xlu1 %v2162_v12 }
 0xd46   :  { %v2161_v13 = vpop.xlane.xlu0 %2160 }
 0xd47   :  { %v2169_v15 = vmul.f32 0.03125, %v2161_v13  ;;  %v2158_v16 = vpop.xlane.xlu1 %2157 }
 0xd48   :  { %v2168_v18 = vmul.f32 0.03125, %v2158_v16 }
 0xd49   :  { %v2173_v0 = vsub.f32 %v2143_v2, %v2169_v15 }
 0xd4a   :  { %v2172_v19 = vsub.f32 %v2138_v5, %v2168_v18  ;;  %v2167_v20 = vpop.xlane.xlu0 %2166 }
 0xd4b   :  { %v2171_v4 = vmul.f32 0.03125, %v2167_v20  ;;  %v2164_v23 = vpop.xlane.xlu1 %2163  ;;  %v2177_v24 = vmul.f32 %v2173_v0, %v2173_v0 }
 0xd4c   :  { %v2170_v54 = vmul.f32 0.03125, %v2164_v23  ;;  %v2176_v51 = vmul.f32 %v2172_v19, %v2172_v19 }
 0xd4d   :  { %v2175_v59 = vsub.f32 %v2153_v58, %v2171_v4  ;;  %v2183_v26 = vsel %vm176_vm0, %v2177_v24, 0.0 }
 0xd4e   :  { %v2174_v14 = vsub.f32 %v2148_v10, %v2170_v54  ;;  %2184 = vadd.xlane.f32.xlu0 %v2183_v26  ;;  %v2180_v17 = vsel %vm176_vm0, %v2176_v51, 0.0 }
 0xd4f   :  { %2181 = vadd.xlane.f32.xlu1 %v2180_v17  ;;  %v2179_v28 = vmul.f32 %v2175_v59, %v2175_v59 }
 0xd50   :  { %v2178_v29 = vmul.f32 %v2174_v14, %v2174_v14 }
 0xd51   :  { %v2189_v56 = vsel %vm176_vm0, %v2179_v28, 0.0 }
 0xd52   :  { %2190 = vadd.xlane.f32.xlu0 %v2189_v56  ;;  %v2186_v30 = vsel %vm176_vm0, %v2178_v29, 0.0 }
 0xd53   :  { %2187 = vadd.xlane.f32.xlu1 %v2186_v30 }
 0xddb   :  { %v2185_v31 = vpop.xlane.xlu0 %2184 }
 0xddc   :  { %v2193_v32 = vmul.f32 0.03125, %v2185_v31  ;;  %v2182_v22 = vpop.xlane.xlu1 %2181 }
 0xddd   :  { %v2192_v21 = vmul.f32 0.03125, %v2182_v22 }
 0xdde   :  { %v2197_v33 = vadd.f32 1e-05, %v2193_v32 }
 0xddf   :  { %v2196_v34 = vadd.f32 1e-05, %v2192_v21  ;;  %v2191_v35 = vpop.xlane.xlu0 %2190 }
 0xde0   :  { %3025 = vrsqrt.f32 %v2197_v33  ;;  %v2195_v62 = vmul.f32 0.03125, %v2191_v35  ;;  %v2188_v36 = vpop.xlane.xlu1 %2187 }
 0xde1   :  { %3027 = vrsqrt.f32 %v2196_v34  ;;  %v2194_v42 = vmul.f32 0.03125, %v2188_v36 }
 0xde2   :  { %v2199_v39 = vadd.f32 1e-05, %v2195_v62 }
 0xde3   :  { %v2198_v37 = vadd.f32 1e-05, %v2194_v42 }
 0xde4   :  { %3029 = vrsqrt.f32 %v2199_v39 }
 0xde5   :  { %3031 = vrsqrt.f32 %v2198_v37 }
 0xdea   :  { %v3026_v40 = vpop.eup %3025 }
 0xdeb   :  { %v3028_v52 = vpop.eup %3027  ;;  %v2205_v55 = vmul.f32 %v3026_v40, %v2173_v0 }
 0xdec   :  { %v2204_v43 = vmul.f32 %v3028_v52, %v2172_v19 }
 0xded   :  { %v2209_v38 = vmul.f32 %v3614_v25, %v2205_v55 }
 0xdee   :  { %v3030_v44 = vpop.eup %3029  ;;  %v2208_v45 = vmul.f32 %v3614_v25, %v2204_v43 }
 0xdef   :  { %v3032_v41 = vpop.eup %3031  ;;  %v2213_v50 = vadd.f32 %v3619_v27, %v2209_v38  ;;  %v2207_v47 = vmul.f32 %v3030_v44, %v2175_v59 }
 0xdf0   :  { %v2212_v48 = vadd.f32 %v3619_v27, %v2208_v45  ;;  %v2206_v46 = vmul.f32 %v3032_v41, %v2174_v14 }
 0xdf1   :  { %v2237_v57 = vcombine.high %v2213_v50, %v2213_v50  ;;  %v2244_v49 = vrot.slane %v2213_v50, %v3221_v8  ;;  %v2211_v60 = vmul.f32 %v3614_v25, %v2207_v47 }
 0xdf2   :  { %v2220_v61 = vcombine.high %v2212_v48, %v2212_v48  ;;  %v2227_v63 = vrot.slane %v2212_v48, %v3221_v8  ;;  %v2210_v1 = vmul.f32 %v3614_v25, %v2206_v46 }
 0xdf3   :  { %v2251_v2 = vrot.slane %v2237_v57, %v3221_v8  ;;  %v2252_v3 = vcombine.high %v2244_v49, %v2244_v49  ;;  %2309 = vst.msk [vmem:[#allocation7 + $0x8] sm:$0x3] %vm2304_vm8, %v2244_v49  ;;  %v2215_v5 = vadd.f32 %v3619_v27, %v2211_v60 }
 0xdf4   :  { %v2234_v6 = vrot.slane %v2220_v61, %v3221_v8  ;;  %v2235_v7 = vcombine.high %v2227_v63, %v2227_v63  ;;  %2305 = vst.msk [vmem:[#allocation7] sm:$0x3] %vm2304_vm8, %v2227_v63  ;;  %v2214_v53 = vadd.f32 %v3619_v27, %v2210_v1 }
 0xdf5   :  { %v2253_v58 = vcombine.high %v2251_v2, %v2251_v2  ;;  %2310 = vst.msk [vmem:[#allocation7 + $0xa] sm:$0x3] %vm2304_vm8, %v2252_v3  ;;  %2311 = vst.msk [vmem:[#allocation7 + $0xc] sm:$0x3] %vm2304_vm8, %v2251_v2  ;;  %v2271_v25 = vcombine.high %v2215_v5, %v2215_v5  ;;  %v2278_v9 = vrot.slane %v2215_v5, %v3221_v8 }
 0xdf6   :  { %v2236_v10 = vcombine.high %v2234_v6, %v2234_v6  ;;  %2306 = vst.msk [vmem:[#allocation7 + $0x2] sm:$0x3] %vm2304_vm8, %v2235_v7  ;;  %2307 = vst.msk [vmem:[#allocation7 + $0x4] sm:$0x3] %vm2304_vm8, %v2234_v6  ;;  %v2254_v11 = vcombine.high %v2214_v53, %v2214_v53  ;;  %v2261_v12 = vrot.slane %v2214_v53, %v3221_v8 }
 0xdf7   :  { %2312 = vst.msk [vmem:[#allocation7 + $0xe] sm:$0x3] %vm2304_vm8, %v2253_v58  ;;  %v2285_v27 = vrot.slane %v2271_v25, %v3221_v8  ;;  %v2286_v13 = vcombine.high %v2278_v9, %v2278_v9  ;;  %2317 = vst.msk [vmem:[#allocation7 + $0x18] sm:$0x3] %vm2304_vm8, %v2278_v9 }
 0xdf8   :  { %2308 = vst.msk [vmem:[#allocation7 + $0x6] sm:$0x3] %vm2304_vm8, %v2236_v10  ;;  %v2268_v15 = vrot.slane %v2254_v11, %v3221_v8  ;;  %v2269_v16 = vcombine.high %v2261_v12, %v2261_v12  ;;  %2313 = vst.msk [vmem:[#allocation7 + $0x10] sm:$0x3] %vm2304_vm8, %v2261_v12 }
 0xdf9   :  { %v2287_v18 = vcombine.high %v2285_v27, %v2285_v27  ;;  %2318 = vst.msk [vmem:[#allocation7 + $0x1a] sm:$0x3] %vm2304_vm8, %v2286_v13  ;;  %2319 = vst.msk [vmem:[#allocation7 + $0x1c] sm:$0x3] %vm2304_vm8, %v2285_v27 }
 0xdfa   :  { %v2270_v0 = vcombine.high %v2268_v15, %v2268_v15  ;;  %2314 = vst.msk [vmem:[#allocation7 + $0x12] sm:$0x3] %vm2304_vm8, %v2269_v16  ;;  %2315 = vst.msk [vmem:[#allocation7 + $0x14] sm:$0x3] %vm2304_vm8, %v2268_v15 }
 0xdfb   :  { %2320 = vst.msk [vmem:[#allocation7 + $0x1e] sm:$0x3] %vm2304_vm8, %v2287_v18 }
 0xdfc   :  { %2316 = vst.msk [vmem:[#allocation7 + $0x16] sm:$0x3] %vm2304_vm8, %v2270_v0 }
 0xdfd   :  { %3088 = shalt.err (!%p3085_p6)
}
 0xdfe   :  { %s3089_s19 = scalar_lea.hbm %s3717_s11, 512 }
 0xdff   :  { %p3090_p7 = scmp.ne.s32.totalorder %s3717_s11, %s3089_s19  ;;  %p3093_p8 = scmp.lt.u32.totalorder %s3089_s19, %s3717_s11 }
 0xe01   :  { %p3095_p9 = pnand %p3093_p8, %p3090_p7 }
 0xe03   :  { %3098 = shalt.err (!%p3095_p9)
}
 0xe04   :  { %s3122_s21 = smov 32   ;;  %s3123_s0 = smov 2  }
 0xe05   :  { %2332 = dma.vmem_to_hbm [thread:$0]  %s2327_s14, 512, %s3717_s11, [#allocation4], %s3122_s21, %s3122_s21, %s3123_s0  }
 0xe06   :  { %3103 = dma.done.wait [#allocation4], 512  }
 0xe07   :  { %3104 = vsyncadd [#allocation4], 4294966784 }
 0xe08   :  { %2336 = vsyncpa [#allocation3], 1 }
 0xe09   :  { %2337 = vsyncpa [#allocation6], 1 }
 0xe0a   :  { %2338 = vsyncpa [#allocation4], 1 }

</bundles_post_ra>
